<compile_context>
chip_gen: v5e
topology: v5e:2x2
jax: 0.10.0
libtpu: 0.0.40
codegen_flags: <defaults>
</compile_context>

<pallas_src>
import jax
import jax.numpy as jnp
from jax.experimental import pallas as pl
from jax.experimental.pallas import tpu as pltpu

COMPUTE_DTYPE = jnp.bfloat16  # MXU-native operand dtype; accumulation stays float32.


def _vmem_limit_bytes():
    """Generation-aware scoped-VMEM limit (v7x: 64 MiB physical, v5e/v6e: 128 MiB)."""
    try:
        cap = int(pltpu.get_tpu_info().vmem_capacity_bytes)
    except Exception:
        cap = 64 * 1024 * 1024
    return min(cap * 3 // 4, 96 * 1024 * 1024)


def _make_fused_conv_kernel(src_taps, C, L, margin):
    """Kernel factory: fused BN -> ReLU -> (implicit pad) -> im2col -> 3x3 conv.

    src_taps: per source array, a list of (tap_id, flat_offset, mask_id|None).
    Tap `tap_id` occupies rows [tap_id*C, (tap_id+1)*C) of the patch matrix and is
    read as a contiguous length-L lane slice of that source's flat margin-padded
    VMEM scratch starting at `flat_offset`.
    """
    S = len(src_taps)

    def kernel(*refs):
        assert len(refs) == 4 + S + 1 + S + 1
        mask_ref, scale_ref, shift_ref, w_ref = refs[:4]
        src_refs = refs[4:4 + S]
        out_ref = refs[4 + S]
        ypad_refs = refs[4 + S + 1:4 + S + 1 + S]
        p_ref = refs[4 + S + 1 + S]

        for s in range(S):
            ypad = ypad_refs[s]
            # Zero margins = the conv's implicit zero padding; interior is overwritten.
            ypad[...] = jnp.zeros_like(ypad)
            scale = scale_ref[pl.ds(s * C, C), :]           # (C, 1) f32
            shift = shift_ref[pl.ds(s * C, C), :]
            x = src_refs[s][0].astype(jnp.float32)          # (C, L)
            y = jnp.maximum(x * scale + shift, 0.0)         # BN(inference) + ReLU (VPU)
            ypad[:, pl.ds(margin, L)] = y.astype(ypad.dtype)
            for tap_id, flat_off, mask_id in src_taps[s]:
                tap = ypad[:, pl.ds(flat_off, L)]
                if mask_id is not None:                     # zero wrapped border columns
                    tap = tap * mask_ref[pl.ds(mask_id, 1), :]
                p_ref[pl.ds(tap_id * C, C), :] = tap.astype(p_ref.dtype)

        # One wide MXU contraction: (Cout, K_total) @ (K_total, L), f32 accumulation.
        out_ref[0] = jax.lax.dot_general(
            w_ref[...], p_ref[...],
            dimension_numbers=(((1,), (0,)), ((), ())),
            preferred_element_type=jnp.float32,
        ).astype(out_ref.dtype)

    return kernel


def _fused_conv3x3(sources, scales, shifts, wmat, masks, src_taps, *, L, margin,
                   scratch_lanes, out_dtype):
    """pallas_call wrapper: grid over batch, whole lane-dense (C, L) tile per step."""
    N, C = sources[0].shape[0], sources[0].shape[1]
    Cout, K_total = wmat.shape
    S = len(sources)
    kernel = _make_fused_conv_kernel(src_taps, C, L, margin)

    in_specs = [
        pl.BlockSpec(masks.shape, lambda n: (0, 0)),    # resident column masks
        pl.BlockSpec(scales.shape, lambda n: (0, 0)),   # per-source BN scale
        pl.BlockSpec(shifts.shape, lambda n: (0, 0)),   # per-source BN shift
        pl.BlockSpec(wmat.shape, lambda n: (0, 0)),     # folded conv weight, resident
    ] + [pl.BlockSpec((1, C, L), lambda n: (n, 0, 0)) for _ in range(S)]

    return pl.pallas_call(
        kernel,
        out_shape=jax.ShapeDtypeStruct((N, Cout, L), out_dtype),
        grid_spec=pltpu.PrefetchScalarGridSpec(
            num_scalar_prefetch=0,
            grid=(N,),
            in_specs=in_specs,
            out_specs=pl.BlockSpec((1, Cout, L), lambda n: (n, 0, 0)),
            scratch_shapes=(
                [pltpu.VMEM((C, scratch_lanes), COMPUTE_DTYPE) for _ in range(S)]
                + [pltpu.VMEM((K_total, L), COMPUTE_DTYPE)]),
        ),
        compiler_params=pltpu.CompilerParams(
            dimension_semantics=("parallel",),
            vmem_limit_bytes=_vmem_limit_bytes()),
    )(masks, scales, shifts, wmat, *sources)


def _bn_scale_shift(gamma, beta, mean, var, eps):
    scale = (gamma / jnp.sqrt(var + eps)).astype(jnp.float32)
    shift = (beta - mean * scale).astype(jnp.float32)
    return scale, shift


def _fold_weight(w):
    """(Cout, Cin, 3, 3) -> (Cout, 9*Cin) with column order k = (kh*3 + kw)*Cin + ci."""
    cout, cin = w.shape[0], w.shape[1]
    return jnp.transpose(w, (0, 2, 3, 1)).reshape(cout, 9 * cin)


def _parity_shift(k):
    """Padded index 2*o + k (k in {0,1,2}) -> (parity plane, in-plane shift in {-1, 0})."""
    if k == 0:
        return 1, -1
    if k == 1:
        return 0, 0
    return 1, 0


def conv1_stride2(x, w, gamma, beta, mean, var, eps=1e-5):
    """BasicConv(k=3, s=2, p=1): BN -> ReLU -> Conv2d. Returns (N, Cout, OH*OW) bf16."""
    N, Cin, H, W = x.shape
    assert H % 2 == 0 and W % 2 == 0, "stride-2 parity-plane path assumes even H, W"
    OH, OW = H // 2, W // 2
    L = OH * OW
    margin = OW + 1
    scratch_lanes = margin + L   # taps only reach up/left -> no right margin needed

    # 4 parity planes of the raw input (the only wrapper-side activation rearrange,
    # ~1x input bytes): plane (pr, pc)[i, j] = x[..., 2i+pr, 2j+pc].  Every stride-2
    # tap then becomes a contiguous slice of one flat plane.
    plane_order = ((0, 0), (0, 1), (1, 0), (1, 1))
    sources = [x[:, :, pr::2, pc::2].reshape(N, Cin, L) for pr, pc in plane_order]

    plane_taps = {po: [] for po in plane_order}
    for kh in range(3):
        pr, dr = _parity_shift(kh)
        for kw in range(3):
            pc, dc = _parity_shift(kw)
            mask_id = 0 if dc == -1 else None   # left-shifted columns wrap -> mask ow==0
            plane_taps[(pr, pc)].append((kh * 3 + kw, margin + dr * OW + dc, mask_id))
    taps = [plane_taps[po] for po in plane_order]

    scale, shift = _bn_scale_shift(gamma, beta, mean, var, eps)
    scales = jnp.tile(scale.reshape(Cin, 1), (len(plane_order), 1))
    shifts = jnp.tile(shift.reshape(Cin, 1), (len(plane_order), 1))
    wmat = _fold_weight(w).astype(COMPUTE_DTYPE)
    masks = (jnp.arange(L) % OW != 0).astype(COMPUTE_DTYPE).reshape(1, L)

    return _fused_conv3x3(sources, scales, shifts, wmat, masks, taps,
                          L=L, margin=margin, scratch_lanes=scratch_lanes,
                          out_dtype=COMPUTE_DTYPE)


def conv2_stride1_concat(a_flat, rem, w, gamma, beta, mean, var, spatial, eps=1e-5):
    """BasicConv(2C -> Cout, k=3, s=1, p=1) on concat([a, rem], channel), with the
    concat folded into the kernel as an accumulated pair of half-weight convolutions."""
    OH, OW = spatial
    N, C, L = a_flat.shape
    Cout = w.shape[0]
    assert w.shape[1] == 2 * C
    margin = OW + 1
    scratch_lanes = L + 2 * (OW + 1)
    rem_flat = rem.reshape(N, C, L)   # free minor-dim merge, stays NCHW

    base = []
    for kh in range(3):
        for kw in range(3):
            mask_id = 0 if kw == 0 else (1 if kw == 2 else None)
            base.append((kh * 3 + kw, margin + (kh - 1) * OW + (kw - 1), mask_id))
    taps = [base, [(t + 9, off, m) for t, off, m in base]]

    scale, shift = _bn_scale_shift(gamma, beta, mean, var, eps)   # over 2C concat channels
    scales = scale.reshape(2 * C, 1)
    shifts = shift.reshape(2 * C, 1)
    wmat = jnp.concatenate(
        [_fold_weight(w[:, :C]), _fold_weight(w[:, C:])], axis=1).astype(COMPUTE_DTYPE)
    col = jnp.arange(L) % OW
    masks = jnp.stack([col != 0, col != OW - 1]).astype(COMPUTE_DTYPE)

    out = _fused_conv3x3([a_flat, rem_flat], scales, shifts, wmat, masks, taps,
                         L=L, margin=margin, scratch_lanes=scratch_lanes,
                         out_dtype=jnp.float32)
    return out.reshape(N, Cout, OH, OW)


def _conv2x_forward(x, rem, params, eps=1e-5):
    """Conv2x.forward, default config: deconv=False, is_3d=False, concat=True, is_conv2=True."""
    # TODO(synk): deconv=True (ConvTranspose2d/3d) and is_3d=True (Conv3d/BatchNorm3d)
    # branches of Conv2x are not exercised by the default configuration and are not
    # implemented here.
    N, Cin, H, W = x.shape
    Cout = params["w1"].shape[0]
    OH, OW = H // 2, W // 2
    a_flat = conv1_stride2(x, params["w1"], params["g1"], params["b1"],
                           params["m1"], params["v1"], eps)
    assert a_flat.shape == (N, Cout, OH * OW)
    assert rem.shape == (N, Cout, OH, OW)        # mirrors `assert x.size() == rem.size()`
    return conv2_stride1_concat(a_flat, rem, params["w2"], params["g2"], params["b2"],
                                params["m2"], params["v2"], (OH, OW), eps)


conv2x_forward = jax.jit(_conv2x_forward)


# ------------------------------- pure-JAX reference -------------------------------
def _ref_basic_conv2d(x, w, gamma, beta, mean, var, stride, eps=1e-5, operand_dtype=None):
    scale = gamma / jnp.sqrt(var + eps)
    shift = beta - mean * scale
    y = jnp.maximum(x * scale[None, :, None, None] + shift[None, :, None, None], 0.0)
    if operand_dtype is not None:   # mirror the kernel's bf16 MXU operands (f32 accum)
        y = y.astype(operand_dtype)
        w = w.astype(operand_dtype)
    return jax.lax.conv_general_dilated(
        y, w, window_strides=(stride, stride), padding=((1, 1), (1, 1)),
        dimension_numbers=("NCHW", "OIHW", "NCHW"),
        preferred_element_type=jnp.float32)


if __name__ == "__main__":
    key = jax.random.PRNGKey(0)
    ks = jax.random.split(key, 8)

    # Input spatial 32 -> both conv outputs are 16x16 = 256 lanes (lane-dense).
    N, Cin, Cout, H, W = 2, 4, 8, 32, 32

    x = jax.random.normal(ks[0], (N, Cin, H, W), jnp.float32)
    rem = jax.random.normal(ks[1], (N, Cout, H // 2, W // 2), jnp.float32)

    params = dict(
        # conv1: BasicConv(Cin -> Cout, k=3, stride=2, pad=1); BN over Cin
        w1=0.1 * jax.random.normal(ks[2], (Cout, Cin, 3, 3), jnp.float32),
        g1=1.0 + 0.1 * jax.random.normal(ks[3], (Cin,), jnp.float32),
        b1=0.1 * jax.random.normal(ks[4], (Cin,), jnp.float32),
        m1=jnp.linspace(-0.5, 0.5, Cin, dtype=jnp.float32),
        v1=jnp.linspace(0.5, 1.5, Cin, dtype=jnp.float32),
        # conv2: BasicConv(2*Cout -> Cout, k=3, stride=1, pad=1); BN over 2*Cout
        w2=0.1 * jax.random.normal(ks[5], (Cout, 2 * Cout, 3, 3), jnp.float32),
        g2=1.0 + 0.1 * jax.random.normal(ks[6], (2 * Cout,), jnp.float32),
        b2=0.1 * jax.random.normal(ks[7], (2 * Cout,), jnp.float32),
        m2=jnp.linspace(-0.3, 0.3, 2 * Cout, dtype=jnp.float32),
        v2=jnp.linspace(0.6, 1.4, 2 * Cout, dtype=jnp.float32),
    )

    out = conv2x_forward(x, rem, params)
    out = jax.block_until_ready(out)
    assert out.shape == (N, Cout, H // 2, W // 2), out.shape

    # (1) precision-matched reference: same bf16 operand rounding as the kernel, f32 accum.
    a_ref = _ref_basic_conv2d(x, params["w1"], params["g1"], params["b1"],
                              params["m1"], params["v1"], 2, operand_dtype=COMPUTE_DTYPE)
    a_ref = a_ref.astype(COMPUTE_DTYPE).astype(jnp.float32)  # conv1 output is stored in bf16
    cat_ref = jnp.concatenate([a_ref, rem], axis=1)
    ref = _ref_basic_conv2d(cat_ref, params["w2"], params["g2"], params["b2"],
                            params["m2"], params["v2"], 1, operand_dtype=COMPUTE_DTYPE)
    err = float(jnp.max(jnp.abs(out - ref)))
    assert jnp.allclose(out, ref, atol=5e-3, rtol=5e-3), err

    # (2) pure-f32 module reference: loose tolerance accounts for bf16 MXU operands.
    a32 = _ref_basic_conv2d(x, params["w1"], params["g1"], params["b1"],
                            params["m1"], params["v1"], 2)
    ref32 = _ref_basic_conv2d(jnp.concatenate([a32, rem], axis=1), params["w2"],
                              params["g2"], params["b2"], params["m2"], params["v2"], 1)
    err32 = float(jnp.max(jnp.abs(out - ref32)))
    assert jnp.allclose(out, ref32, atol=5e-2, rtol=5e-2), err32

    print("KERNEL_OK")
</pallas_src>

<mosaic_0001>
module attributes {stable_mosaic.version = 11 : i64} {
  func.func @kernel(%arg0: i32, %arg1: memref<1x256xbf16, #tpu.memory_space<vmem>>, %arg2: memref<16x1xf32, #tpu.memory_space<vmem>>, %arg3: memref<16x1xf32, #tpu.memory_space<vmem>>, %arg4: memref<8x36xbf16, #tpu.memory_space<vmem>>, %arg5: memref<1x4x256xf32, #tpu.memory_space<vmem>>, %arg6: memref<1x4x256xf32, #tpu.memory_space<vmem>>, %arg7: memref<1x4x256xf32, #tpu.memory_space<vmem>>, %arg8: memref<1x4x256xf32, #tpu.memory_space<vmem>>, %arg9: memref<1x8x256xbf16, #tpu.memory_space<vmem>>, %arg10: memref<4x273xbf16, #tpu.memory_space<vmem>>, %arg11: memref<4x273xbf16, #tpu.memory_space<vmem>>, %arg12: memref<4x273xbf16, #tpu.memory_space<vmem>>, %arg13: memref<4x273xbf16, #tpu.memory_space<vmem>>, %arg14: memref<36x256xbf16, #tpu.memory_space<vmem>>) attributes {dimension_semantics = [#tpu.dimension_semantics<parallel>], iteration_bounds = array<i64: 2>, scalar_prefetch = 0 : i64, scratch_operands = 5 : i64, tpu.core_type = #tpu.core_type<tc>, window_params = [{pipeline_mode = #tpu.pipeline_mode<synchronous>, transform_indices = @transform_0, window_bounds = array<i64: 1, 256>}, {pipeline_mode = #tpu.pipeline_mode<synchronous>, transform_indices = @transform_1, window_bounds = array<i64: 16, 1>}, {pipeline_mode = #tpu.pipeline_mode<synchronous>, transform_indices = @transform_2, window_bounds = array<i64: 16, 1>}, {pipeline_mode = #tpu.pipeline_mode<synchronous>, transform_indices = @transform_3, window_bounds = array<i64: 8, 36>}, {transform_indices = @transform_4, window_bounds = array<i64: 1, 4, 256>}, {transform_indices = @transform_5, window_bounds = array<i64: 1, 4, 256>}, {transform_indices = @transform_6, window_bounds = array<i64: 1, 4, 256>}, {transform_indices = @transform_7, window_bounds = array<i64: 1, 4, 256>}, {transform_indices = @transform_8, window_bounds = array<i64: 1, 8, 256>}]} {
    %cst = arith.constant 0.000000e+00 : bf16
    %0 = vector.broadcast %cst : bf16 to vector<4x273xbf16>
    %c0 = arith.constant 0 : index
    %c0_0 = arith.constant 0 : index
    %1 = vector.load %arg10[%c0, %c0_0] : memref<4x273xbf16, #tpu.memory_space<vmem>>, vector<4x273xbf16>
    tpu.vector_store %arg10[%c0, %c0_0], %0 {strides = array<i32>} : memref<4x273xbf16, #tpu.memory_space<vmem>>, vector<4x273xbf16>,
    %c0_1 = arith.constant 0 : index
    %c0_2 = arith.constant 0 : index
    %2 = vector.load %arg2[%c0_1, %c0_2] : memref<16x1xf32, #tpu.memory_space<vmem>>, vector<4x1xf32>
    %c0_3 = arith.constant 0 : index
    %c0_4 = arith.constant 0 : index
    %3 = vector.load %arg3[%c0_3, %c0_4] : memref<16x1xf32, #tpu.memory_space<vmem>>, vector<4x1xf32>
    %c0_5 = arith.constant 0 : index
    %c0_6 = arith.constant 0 : index
    %c0_7 = arith.constant 0 : index
    %4 = vector.load %arg5[%c0_5, %c0_6, %c0_7] : memref<1x4x256xf32, #tpu.memory_space<vmem>>, vector<1x4x256xf32>
    %5 = vector.shape_cast %4 : vector<1x4x256xf32> to vector<4x256xf32>
    %6 = vector.broadcast %2 : vector<4x1xf32> to vector<4x256xf32>
    %7 = arith.mulf %5, %6 : vector<4x256xf32>
    %8 = vector.broadcast %3 : vector<4x1xf32> to vector<4x256xf32>
    %9 = arith.addf %7, %8 : vector<4x256xf32>
    %cst_8 = arith.constant 0.000000e+00 : f32
    %10 = vector.broadcast %cst_8 : f32 to vector<4x256xf32>
    %11 = arith.maximumf %9, %10 : vector<4x256xf32>
    %12 = arith.truncf %11 : vector<4x256xf32> to vector<4x256xbf16>
    %c0_9 = arith.constant 0 : index
    %c17 = arith.constant 17 : index
    %13 = vector.load %arg10[%c0_9, %c17] : memref<4x273xbf16, #tpu.memory_space<vmem>>, vector<4x256xbf16>
    tpu.vector_store %arg10[%c0_9, %c17], %12 {strides = array<i32>} : memref<4x273xbf16, #tpu.memory_space<vmem>>, vector<4x256xbf16>,
    %c0_10 = arith.constant 0 : index
    %c17_11 = arith.constant 17 : index
    %14 = vector.load %arg10[%c0_10, %c17_11] : memref<4x273xbf16, #tpu.memory_space<vmem>>, vector<4x256xbf16>
    %c16 = arith.constant 16 : index
    %c0_12 = arith.constant 0 : index
    %15 = vector.load %arg14[%c16, %c0_12] : memref<36x256xbf16, #tpu.memory_space<vmem>>, vector<4x256xbf16>
    tpu.vector_store %arg14[%c16, %c0_12], %14 {strides = array<i32>} : memref<36x256xbf16, #tpu.memory_space<vmem>>, vector<4x256xbf16>,
    %cst_13 = arith.constant 0.000000e+00 : bf16
    %16 = vector.broadcast %cst_13 : bf16 to vector<4x273xbf16>
    %c0_14 = arith.constant 0 : index
    %c0_15 = arith.constant 0 : index
    %17 = vector.load %arg11[%c0_14, %c0_15] : memref<4x273xbf16, #tpu.memory_space<vmem>>, vector<4x273xbf16>
    tpu.vector_store %arg11[%c0_14, %c0_15], %16 {strides = array<i32>} : memref<4x273xbf16, #tpu.memory_space<vmem>>, vector<4x273xbf16>,
    %c4 = arith.constant 4 : index
    %c0_16 = arith.constant 0 : index
    %18 = vector.load %arg2[%c4, %c0_16] : memref<16x1xf32, #tpu.memory_space<vmem>>, vector<4x1xf32>
    %c4_17 = arith.constant 4 : index
    %c0_18 = arith.constant 0 : index
    %19 = vector.load %arg3[%c4_17, %c0_18] : memref<16x1xf32, #tpu.memory_space<vmem>>, vector<4x1xf32>
    %c0_19 = arith.constant 0 : index
    %c0_20 = arith.constant 0 : index
    %c0_21 = arith.constant 0 : index
    %20 = vector.load %arg6[%c0_19, %c0_20, %c0_21] : memref<1x4x256xf32, #tpu.memory_space<vmem>>, vector<1x4x256xf32>
    %21 = vector.shape_cast %20 : vector<1x4x256xf32> to vector<4x256xf32>
    %22 = vector.broadcast %18 : vector<4x1xf32> to vector<4x256xf32>
    %23 = arith.mulf %21, %22 : vector<4x256xf32>
    %24 = vector.broadcast %19 : vector<4x1xf32> to vector<4x256xf32>
    %25 = arith.addf %23, %24 : vector<4x256xf32>
    %cst_22 = arith.constant 0.000000e+00 : f32
    %26 = vector.broadcast %cst_22 : f32 to vector<4x256xf32>
    %27 = arith.maximumf %25, %26 : vector<4x256xf32>
    %28 = arith.truncf %27 : vector<4x256xf32> to vector<4x256xbf16>
    %c0_23 = arith.constant 0 : index
    %c17_24 = arith.constant 17 : index
    %29 = vector.load %arg11[%c0_23, %c17_24] : memref<4x273xbf16, #tpu.memory_space<vmem>>, vector<4x256xbf16>
    tpu.vector_store %arg11[%c0_23, %c17_24], %28 {strides = array<i32>} : memref<4x273xbf16, #tpu.memory_space<vmem>>, vector<4x256xbf16>,
    %c0_25 = arith.constant 0 : index
    %c16_26 = arith.constant 16 : index
    %30 = vector.load %arg11[%c0_25, %c16_26] : memref<4x273xbf16, #tpu.memory_space<vmem>>, vector<4x256xbf16>
    %c0_27 = arith.constant 0 : index
    %c0_28 = arith.constant 0 : index
    %31 = vector.load %arg1[%c0_27, %c0_28] : memref<1x256xbf16, #tpu.memory_space<vmem>>, vector<1x256xbf16>
    %32 = vector.broadcast %31 : vector<1x256xbf16> to vector<4x256xbf16>
    %33 = arith.mulf %30, %32 : vector<4x256xbf16>
    %c12 = arith.constant 12 : index
    %c0_29 = arith.constant 0 : index
    %34 = vector.load %arg14[%c12, %c0_29] : memref<36x256xbf16, #tpu.memory_space<vmem>>, vector<4x256xbf16>
    tpu.vector_store %arg14[%c12, %c0_29], %33 {strides = array<i32>} : memref<36x256xbf16, #tpu.memory_space<vmem>>, vector<4x256xbf16>,
    %c0_30 = arith.constant 0 : index
    %c17_31 = arith.constant 17 : index
    %35 = vector.load %arg11[%c0_30, %c17_31] : memref<4x273xbf16, #tpu.memory_space<vmem>>, vector<4x256xbf16>
    %c20 = arith.constant 20 : index
    %c0_32 = arith.constant 0 : index
    %36 = vector.load %arg14[%c20, %c0_32] : memref<36x256xbf16, #tpu.memory_space<vmem>>, vector<4x256xbf16>
    tpu.vector_store %arg14[%c20, %c0_32], %35 {strides = array<i32>} : memref<36x256xbf16, #tpu.memory_space<vmem>>, vector<4x256xbf16>,
    %cst_33 = arith.constant 0.000000e+00 : bf16
    %37 = vector.broadcast %cst_33 : bf16 to vector<4x273xbf16>
    %c0_34 = arith.constant 0 : index
    %c0_35 = arith.constant 0 : index
    %38 = vector.load %arg12[%c0_34, %c0_35] : memref<4x273xbf16, #tpu.memory_space<vmem>>, vector<4x273xbf16>
    tpu.vector_store %arg12[%c0_34, %c0_35], %37 {strides = array<i32>} : memref<4x273xbf16, #tpu.memory_space<vmem>>, vector<4x273xbf16>,
    %c8 = arith.constant 8 : index
    %c0_36 = arith.constant 0 : index
    %39 = vector.load %arg2[%c8, %c0_36] : memref<16x1xf32, #tpu.memory_space<vmem>>, vector<4x1xf32>
    %c8_37 = arith.constant 8 : index
    %c0_38 = arith.constant 0 : index
    %40 = vector.load %arg3[%c8_37, %c0_38] : memref<16x1xf32, #tpu.memory_space<vmem>>, vector<4x1xf32>
    %c0_39 = arith.constant 0 : index
    %c0_40 = arith.constant 0 : index
    %c0_41 = arith.constant 0 : index
    %41 = vector.load %arg7[%c0_39, %c0_40, %c0_41] : memref<1x4x256xf32, #tpu.memory_space<vmem>>, vector<1x4x256xf32>
    %42 = vector.shape_cast %41 : vector<1x4x256xf32> to vector<4x256xf32>
    %43 = vector.broadcast %39 : vector<4x1xf32> to vector<4x256xf32>
    %44 = arith.mulf %42, %43 : vector<4x256xf32>
    %45 = vector.broadcast %40 : vector<4x1xf32> to vector<4x256xf32>
    %46 = arith.addf %44, %45 : vector<4x256xf32>
    %cst_42 = arith.constant 0.000000e+00 : f32
    %47 = vector.broadcast %cst_42 : f32 to vector<4x256xf32>
    %48 = arith.maximumf %46, %47 : vector<4x256xf32>
    %49 = arith.truncf %48 : vector<4x256xf32> to vector<4x256xbf16>
    %c0_43 = arith.constant 0 : index
    %c17_44 = arith.constant 17 : index
    %50 = vector.load %arg12[%c0_43, %c17_44] : memref<4x273xbf16, #tpu.memory_space<vmem>>, vector<4x256xbf16>
    tpu.vector_store %arg12[%c0_43, %c17_44], %49 {strides = array<i32>} : memref<4x273xbf16, #tpu.memory_space<vmem>>, vector<4x256xbf16>,
    %c0_45 = arith.constant 0 : index
    %c1 = arith.constant 1 : index
    %51 = vector.load %arg12[%c0_45, %c1] : memref<4x273xbf16, #tpu.memory_space<vmem>>, vector<4x256xbf16>
    %c4_46 = arith.constant 4 : index
    %c0_47 = arith.constant 0 : index
    %52 = vector.load %arg14[%c4_46, %c0_47] : memref<36x256xbf16, #tpu.memory_space<vmem>>, vector<4x256xbf16>
    tpu.vector_store %arg14[%c4_46, %c0_47], %51 {strides = array<i32>} : memref<36x256xbf16, #tpu.memory_space<vmem>>, vector<4x256xbf16>,
    %c0_48 = arith.constant 0 : index
    %c17_49 = arith.constant 17 : index
    %53 = vector.load %arg12[%c0_48, %c17_49] : memref<4x273xbf16, #tpu.memory_space<vmem>>, vector<4x256xbf16>
    %c28 = arith.constant 28 : index
    %c0_50 = arith.constant 0 : index
    %54 = vector.load %arg14[%c28, %c0_50] : memref<36x256xbf16, #tpu.memory_space<vmem>>, vector<4x256xbf16>
    tpu.vector_store %arg14[%c28, %c0_50], %53 {strides = array<i32>} : memref<36x256xbf16, #tpu.memory_space<vmem>>, vector<4x256xbf16>,
    %cst_51 = arith.constant 0.000000e+00 : bf16
    %55 = vector.broadcast %cst_51 : bf16 to vector<4x273xbf16>
    %c0_52 = arith.constant 0 : index
    %c0_53 = arith.constant 0 : index
    %56 = vector.load %arg13[%c0_52, %c0_53] : memref<4x273xbf16, #tpu.memory_space<vmem>>, vector<4x273xbf16>
    tpu.vector_store %arg13[%c0_52, %c0_53], %55 {strides = array<i32>} : memref<4x273xbf16, #tpu.memory_space<vmem>>, vector<4x273xbf16>,
    %c12_54 = arith.constant 12 : index
    %c0_55 = arith.constant 0 : index
    %57 = vector.load %arg2[%c12_54, %c0_55] : memref<16x1xf32, #tpu.memory_space<vmem>>, vector<4x1xf32>
    %c12_56 = arith.constant 12 : index
    %c0_57 = arith.constant 0 : index
    %58 = vector.load %arg3[%c12_56, %c0_57] : memref<16x1xf32, #tpu.memory_space<vmem>>, vector<4x1xf32>
    %c0_58 = arith.constant 0 : index
    %c0_59 = arith.constant 0 : index
    %c0_60 = arith.constant 0 : index
    %59 = vector.load %arg8[%c0_58, %c0_59, %c0_60] : memref<1x4x256xf32, #tpu.memory_space<vmem>>, vector<1x4x256xf32>
    %60 = vector.shape_cast %59 : vector<1x4x256xf32> to vector<4x256xf32>
    %61 = vector.broadcast %57 : vector<4x1xf32> to vector<4x256xf32>
    %62 = arith.mulf %60, %61 : vector<4x256xf32>
    %63 = vector.broadcast %58 : vector<4x1xf32> to vector<4x256xf32>
    %64 = arith.addf %62, %63 : vector<4x256xf32>
    %cst_61 = arith.constant 0.000000e+00 : f32
    %65 = vector.broadcast %cst_61 : f32 to vector<4x256xf32>
    %66 = arith.maximumf %64, %65 : vector<4x256xf32>
    %67 = arith.truncf %66 : vector<4x256xf32> to vector<4x256xbf16>
    %c0_62 = arith.constant 0 : index
    %c17_63 = arith.constant 17 : index
    %68 = vector.load %arg13[%c0_62, %c17_63] : memref<4x273xbf16, #tpu.memory_space<vmem>>, vector<4x256xbf16>
    tpu.vector_store %arg13[%c0_62, %c17_63], %67 {strides = array<i32>} : memref<4x273xbf16, #tpu.memory_space<vmem>>, vector<4x256xbf16>,
    %c0_64 = arith.constant 0 : index
    %c0_65 = arith.constant 0 : index
    %69 = vector.load %arg13[%c0_64, %c0_65] : memref<4x273xbf16, #tpu.memory_space<vmem>>, vector<4x256xbf16>
    %c0_66 = arith.constant 0 : index
    %c0_67 = arith.constant 0 : index
    %70 = vector.load %arg1[%c0_66, %c0_67] : memref<1x256xbf16, #tpu.memory_space<vmem>>, vector<1x256xbf16>
    %71 = vector.broadcast %70 : vector<1x256xbf16> to vector<4x256xbf16>
    %72 = arith.mulf %69, %71 : vector<4x256xbf16>
    %c0_68 = arith.constant 0 : index
    %c0_69 = arith.constant 0 : index
    %73 = vector.load %arg14[%c0_68, %c0_69] : memref<36x256xbf16, #tpu.memory_space<vmem>>, vector<4x256xbf16>
    tpu.vector_store %arg14[%c0_68, %c0_69], %72 {strides = array<i32>} : memref<36x256xbf16, #tpu.memory_space<vmem>>, vector<4x256xbf16>,
    %c0_70 = arith.constant 0 : index
    %c1_71 = arith.constant 1 : index
    %74 = vector.load %arg13[%c0_70, %c1_71] : memref<4x273xbf16, #tpu.memory_space<vmem>>, vector<4x256xbf16>
    %c8_72 = arith.constant 8 : index
    %c0_73 = arith.constant 0 : index
    %75 = vector.load %arg14[%c8_72, %c0_73] : memref<36x256xbf16, #tpu.memory_space<vmem>>, vector<4x256xbf16>
    tpu.vector_store %arg14[%c8_72, %c0_73], %74 {strides = array<i32>} : memref<36x256xbf16, #tpu.memory_space<vmem>>, vector<4x256xbf16>,
    %c0_74 = arith.constant 0 : index
    %c16_75 = arith.constant 16 : index
    %76 = vector.load %arg13[%c0_74, %c16_75] : memref<4x273xbf16, #tpu.memory_space<vmem>>, vector<4x256xbf16>
    %c0_76 = arith.constant 0 : index
    %c0_77 = arith.constant 0 : index
    %77 = vector.load %arg1[%c0_76, %c0_77] : memref<1x256xbf16, #tpu.memory_space<vmem>>, vector<1x256xbf16>
    %78 = vector.broadcast %77 : vector<1x256xbf16> to vector<4x256xbf16>
    %79 = arith.mulf %76, %78 : vector<4x256xbf16>
    %c24 = arith.constant 24 : index
    %c0_78 = arith.constant 0 : index
    %80 = vector.load %arg14[%c24, %c0_78] : memref<36x256xbf16, #tpu.memory_space<vmem>>, vector<4x256xbf16>
    tpu.vector_store %arg14[%c24, %c0_78], %79 {strides = array<i32>} : memref<36x256xbf16, #tpu.memory_space<vmem>>, vector<4x256xbf16>,
    %c0_79 = arith.constant 0 : index
    %c17_80 = arith.constant 17 : index
    %81 = vector.load %arg13[%c0_79, %c17_80] : memref<4x273xbf16, #tpu.memory_space<vmem>>, vector<4x256xbf16>
    %c32 = arith.constant 32 : index
    %c0_81 = arith.constant 0 : index
    %82 = vector.load %arg14[%c32, %c0_81] : memref<36x256xbf16, #tpu.memory_space<vmem>>, vector<4x256xbf16>
    tpu.vector_store %arg14[%c32, %c0_81], %81 {strides = array<i32>} : memref<36x256xbf16, #tpu.memory_space<vmem>>, vector<4x256xbf16>,
    %c0_82 = arith.constant 0 : index
    %c0_83 = arith.constant 0 : index
    %83 = vector.load %arg4[%c0_82, %c0_83] : memref<8x36xbf16, #tpu.memory_space<vmem>>, vector<8x36xbf16>
    %c0_84 = arith.constant 0 : index
    %c0_85 = arith.constant 0 : index
    %84 = vector.load %arg14[%c0_84, %c0_85] : memref<36x256xbf16, #tpu.memory_space<vmem>>, vector<36x256xbf16>
    %cst_86 = arith.constant dense<0.000000e+00> : vector<8x256xf32>
    %85 = tpu.matmul %83, %84, %cst_86 {dimension_numbers = #tpu.dot_dimension_numbers<[1], [0], [0], [1], [0, 0, 1, 1], [], []>} : vector<8x36xbf16>, vector<36x256xbf16>, vector<8x256xf32> -> vector<8x256xf32>
    %86 = arith.truncf %85 : vector<8x256xf32> to vector<8x256xbf16>
    %c0_87 = arith.constant 0 : index
    %c0_88 = arith.constant 0 : index
    %c0_89 = arith.constant 0 : index
    %87 = vector.load %arg9[%c0_87, %c0_88, %c0_89] : memref<1x8x256xbf16, #tpu.memory_space<vmem>>, vector<1x8x256xbf16>
    %88 = vector.shape_cast %87 : vector<1x8x256xbf16> to vector<8x256xbf16>
    %89 = vector.shape_cast %86 : vector<8x256xbf16> to vector<1x8x256xbf16>
    tpu.vector_store %arg9[%c0_87, %c0_88, %c0_89], %89 {strides = array<i32>} : memref<1x8x256xbf16, #tpu.memory_space<vmem>>, vector<1x8x256xbf16>,
    return
  }
  func.func @transform_0(%arg0: i32) -> (i32, i32) {
    %c0_i32 = arith.constant 0 : i32
    %c0_i32_0 = arith.constant 0 : i32
    %c0_i32_1 = arith.constant 0 : i32
    return %c0_i32, %c0_i32_0 : i32, i32
  }
  func.func @transform_1(%arg0: i32) -> (i32, i32) {
    %c0_i32 = arith.constant 0 : i32
    %c0_i32_0 = arith.constant 0 : i32
    %c0_i32_1 = arith.constant 0 : i32
    return %c0_i32, %c0_i32_0 : i32, i32
  }
  func.func @transform_2(%arg0: i32) -> (i32, i32) {
    %c0_i32 = arith.constant 0 : i32
    %c0_i32_0 = arith.constant 0 : i32
    %c0_i32_1 = arith.constant 0 : i32
    return %c0_i32, %c0_i32_0 : i32, i32
  }
  func.func @transform_3(%arg0: i32) -> (i32, i32) {
    %c0_i32 = arith.constant 0 : i32
    %c0_i32_0 = arith.constant 0 : i32
    %c0_i32_1 = arith.constant 0 : i32
    return %c0_i32, %c0_i32_0 : i32, i32
  }
  func.func @transform_4(%arg0: i32) -> (i32, i32, i32) {
    %c0_i32 = arith.constant 0 : i32
    %c0_i32_0 = arith.constant 0 : i32
    %c0_i32_1 = arith.constant 0 : i32
    return %arg0, %c0_i32, %c0_i32_0 : i32, i32, i32
  }
  func.func @transform_5(%arg0: i32) -> (i32, i32, i32) {
    %c0_i32 = arith.constant 0 : i32
    %c0_i32_0 = arith.constant 0 : i32
    %c0_i32_1 = arith.constant 0 : i32
    return %arg0, %c0_i32, %c0_i32_0 : i32, i32, i32
  }
  func.func @transform_6(%arg0: i32) -> (i32, i32, i32) {
    %c0_i32 = arith.constant 0 : i32
    %c0_i32_0 = arith.constant 0 : i32
    %c0_i32_1 = arith.constant 0 : i32
    return %arg0, %c0_i32, %c0_i32_0 : i32, i32, i32
  }
  func.func @transform_7(%arg0: i32) -> (i32, i32, i32) {
    %c0_i32 = arith.constant 0 : i32
    %c0_i32_0 = arith.constant 0 : i32
    %c0_i32_1 = arith.constant 0 : i32
    return %arg0, %c0_i32, %c0_i32_0 : i32, i32, i32
  }
  func.func @transform_8(%arg0: i32) -> (i32, i32, i32) {
    %c0_i32 = arith.constant 0 : i32
    %c0_i32_0 = arith.constant 0 : i32
    %c0_i32_1 = arith.constant 0 : i32
    return %arg0, %c0_i32, %c0_i32_0 : i32, i32, i32
  }
}

module attributes {stable_mosaic.version = 11 : i64} {
  func.func @kernel(%arg0: i32, %arg1: memref<2x256xbf16, #tpu.memory_space<vmem>>, %arg2: memref<16x1xf32, #tpu.memory_space<vmem>>, %arg3: memref<16x1xf32, #tpu.memory_space<vmem>>, %arg4: memref<8x144xbf16, #tpu.memory_space<vmem>>, %arg5: memref<1x8x256xbf16, #tpu.memory_space<vmem>>, %arg6: memref<1x8x256xf32, #tpu.memory_space<vmem>>, %arg7: memref<1x8x256xf32, #tpu.memory_space<vmem>>, %arg8: memref<8x290xbf16, #tpu.memory_space<vmem>>, %arg9: memref<8x290xbf16, #tpu.memory_space<vmem>>, %arg10: memref<144x256xbf16, #tpu.memory_space<vmem>>) attributes {dimension_semantics = [#tpu.dimension_semantics<parallel>], iteration_bounds = array<i64: 2>, scalar_prefetch = 0 : i64, scratch_operands = 3 : i64, tpu.core_type = #tpu.core_type<tc>, window_params = [{pipeline_mode = #tpu.pipeline_mode<synchronous>, transform_indices = @transform_0, window_bounds = array<i64: 2, 256>}, {pipeline_mode = #tpu.pipeline_mode<synchronous>, transform_indices = @transform_1, window_bounds = array<i64: 16, 1>}, {pipeline_mode = #tpu.pipeline_mode<synchronous>, transform_indices = @transform_2, window_bounds = array<i64: 16, 1>}, {pipeline_mode = #tpu.pipeline_mode<synchronous>, transform_indices = @transform_3, window_bounds = array<i64: 8, 144>}, {transform_indices = @transform_4, window_bounds = array<i64: 1, 8, 256>}, {transform_indices = @transform_5, window_bounds = array<i64: 1, 8, 256>}, {transform_indices = @transform_6, window_bounds = array<i64: 1, 8, 256>}]} {
    %cst = arith.constant 0.000000e+00 : bf16
    %0 = vector.broadcast %cst : bf16 to vector<8x290xbf16>
    %c0 = arith.constant 0 : index
    %c0_0 = arith.constant 0 : index
    %1 = vector.load %arg8[%c0, %c0_0] : memref<8x290xbf16, #tpu.memory_space<vmem>>, vector<8x290xbf16>
    tpu.vector_store %arg8[%c0, %c0_0], %0 {strides = array<i32>} : memref<8x290xbf16, #tpu.memory_space<vmem>>, vector<8x290xbf16>,
    %c0_1 = arith.constant 0 : index
    %c0_2 = arith.constant 0 : index
    %2 = vector.load %arg2[%c0_1, %c0_2] : memref<16x1xf32, #tpu.memory_space<vmem>>, vector<8x1xf32>
    %c0_3 = arith.constant 0 : index
    %c0_4 = arith.constant 0 : index
    %3 = vector.load %arg3[%c0_3, %c0_4] : memref<16x1xf32, #tpu.memory_space<vmem>>, vector<8x1xf32>
    %c0_5 = arith.constant 0 : index
    %c0_6 = arith.constant 0 : index
    %c0_7 = arith.constant 0 : index
    %4 = vector.load %arg5[%c0_5, %c0_6, %c0_7] : memref<1x8x256xbf16, #tpu.memory_space<vmem>>, vector<1x8x256xbf16>
    %5 = vector.shape_cast %4 : vector<1x8x256xbf16> to vector<8x256xbf16>
    %6 = arith.extf %5 : vector<8x256xbf16> to vector<8x256xf32>
    %7 = vector.broadcast %2 : vector<8x1xf32> to vector<8x256xf32>
    %8 = arith.mulf %6, %7 : vector<8x256xf32>
    %9 = vector.broadcast %3 : vector<8x1xf32> to vector<8x256xf32>
    %10 = arith.addf %8, %9 : vector<8x256xf32>
    %cst_8 = arith.constant 0.000000e+00 : f32
    %11 = vector.broadcast %cst_8 : f32 to vector<8x256xf32>
    %12 = arith.maximumf %10, %11 : vector<8x256xf32>
    %13 = arith.truncf %12 : vector<8x256xf32> to vector<8x256xbf16>
    %c0_9 = arith.constant 0 : index
    %c17 = arith.constant 17 : index
    %14 = vector.load %arg8[%c0_9, %c17] : memref<8x290xbf16, #tpu.memory_space<vmem>>, vector<8x256xbf16>
    tpu.vector_store %arg8[%c0_9, %c17], %13 {strides = array<i32>} : memref<8x290xbf16, #tpu.memory_space<vmem>>, vector<8x256xbf16>,
    %c0_10 = arith.constant 0 : index
    %c0_11 = arith.constant 0 : index
    %15 = vector.load %arg8[%c0_10, %c0_11] : memref<8x290xbf16, #tpu.memory_space<vmem>>, vector<8x256xbf16>
    %c0_12 = arith.constant 0 : index
    %c0_13 = arith.constant 0 : index
    %16 = vector.load %arg1[%c0_12, %c0_13] : memref<2x256xbf16, #tpu.memory_space<vmem>>, vector<1x256xbf16>
    %17 = vector.broadcast %16 : vector<1x256xbf16> to vector<8x256xbf16>
    %18 = arith.mulf %15, %17 : vector<8x256xbf16>
    %c0_14 = arith.constant 0 : index
    %c0_15 = arith.constant 0 : index
    %19 = vector.load %arg10[%c0_14, %c0_15] : memref<144x256xbf16, #tpu.memory_space<vmem>>, vector<8x256xbf16>
    tpu.vector_store %arg10[%c0_14, %c0_15], %18 {strides = array<i32>} : memref<144x256xbf16, #tpu.memory_space<vmem>>, vector<8x256xbf16>,
    %c0_16 = arith.constant 0 : index
    %c1 = arith.constant 1 : index
    %20 = vector.load %arg8[%c0_16, %c1] : memref<8x290xbf16, #tpu.memory_space<vmem>>, vector<8x256xbf16>
    %c8 = arith.constant 8 : index
    %c0_17 = arith.constant 0 : index
    %21 = vector.load %arg10[%c8, %c0_17] : memref<144x256xbf16, #tpu.memory_space<vmem>>, vector<8x256xbf16>
    tpu.vector_store %arg10[%c8, %c0_17], %20 {strides = array<i32>} : memref<144x256xbf16, #tpu.memory_space<vmem>>, vector<8x256xbf16>,
    %c0_18 = arith.constant 0 : index
    %c2 = arith.constant 2 : index
    %22 = vector.load %arg8[%c0_18, %c2] : memref<8x290xbf16, #tpu.memory_space<vmem>>, vector<8x256xbf16>
    %c1_19 = arith.constant 1 : index
    %c0_20 = arith.constant 0 : index
    %23 = vector.load %arg1[%c1_19, %c0_20] : memref<2x256xbf16, #tpu.memory_space<vmem>>, vector<1x256xbf16>
    %24 = vector.broadcast %23 : vector<1x256xbf16> to vector<8x256xbf16>
    %25 = arith.mulf %22, %24 : vector<8x256xbf16>
    %c16 = arith.constant 16 : index
    %c0_21 = arith.constant 0 : index
    %26 = vector.load %arg10[%c16, %c0_21] : memref<144x256xbf16, #tpu.memory_space<vmem>>, vector<8x256xbf16>
    tpu.vector_store %arg10[%c16, %c0_21], %25 {strides = array<i32>} : memref<144x256xbf16, #tpu.memory_space<vmem>>, vector<8x256xbf16>,
    %c0_22 = arith.constant 0 : index
    %c16_23 = arith.constant 16 : index
    %27 = vector.load %arg8[%c0_22, %c16_23] : memref<8x290xbf16, #tpu.memory_space<vmem>>, vector<8x256xbf16>
    %c0_24 = arith.constant 0 : index
    %c0_25 = arith.constant 0 : index
    %28 = vector.load %arg1[%c0_24, %c0_25] : memref<2x256xbf16, #tpu.memory_space<vmem>>, vector<1x256xbf16>
    %29 = vector.broadcast %28 : vector<1x256xbf16> to vector<8x256xbf16>
    %30 = arith.mulf %27, %29 : vector<8x256xbf16>
    %c24 = arith.constant 24 : index
    %c0_26 = arith.constant 0 : index
    %31 = vector.load %arg10[%c24, %c0_26] : memref<144x256xbf16, #tpu.memory_space<vmem>>, vector<8x256xbf16>
    tpu.vector_store %arg10[%c24, %c0_26], %30 {strides = array<i32>} : memref<144x256xbf16, #tpu.memory_space<vmem>>, vector<8x256xbf16>,
    %c0_27 = arith.constant 0 : index
    %c17_28 = arith.constant 17 : index
    %32 = vector.load %arg8[%c0_27, %c17_28] : memref<8x290xbf16, #tpu.memory_space<vmem>>, vector<8x256xbf16>
    %c32 = arith.constant 32 : index
    %c0_29 = arith.constant 0 : index
    %33 = vector.load %arg10[%c32, %c0_29] : memref<144x256xbf16, #tpu.memory_space<vmem>>, vector<8x256xbf16>
    tpu.vector_store %arg10[%c32, %c0_29], %32 {strides = array<i32>} : memref<144x256xbf16, #tpu.memory_space<vmem>>, vector<8x256xbf16>,
    %c0_30 = arith.constant 0 : index
    %c18 = arith.constant 18 : index
    %34 = vector.load %arg8[%c0_30, %c18] : memref<8x290xbf16, #tpu.memory_space<vmem>>, vector<8x256xbf16>
    %c1_31 = arith.constant 1 : index
    %c0_32 = arith.constant 0 : index
    %35 = vector.load %arg1[%c1_31, %c0_32] : memref<2x256xbf16, #tpu.memory_space<vmem>>, vector<1x256xbf16>
    %36 = vector.broadcast %35 : vector<1x256xbf16> to vector<8x256xbf16>
    %37 = arith.mulf %34, %36 : vector<8x256xbf16>
    %c40 = arith.constant 40 : index
    %c0_33 = arith.constant 0 : index
    %38 = vector.load %arg10[%c40, %c0_33] : memref<144x256xbf16, #tpu.memory_space<vmem>>, vector<8x256xbf16>
    tpu.vector_store %arg10[%c40, %c0_33], %37 {strides = array<i32>} : memref<144x256xbf16, #tpu.memory_space<vmem>>, vector<8x256xbf16>,
    %c0_34 = arith.constant 0 : index
    %c32_35 = arith.constant 32 : index
    %39 = vector.load %arg8[%c0_34, %c32_35] : memref<8x290xbf16, #tpu.memory_space<vmem>>, vector<8x256xbf16>
    %c0_36 = arith.constant 0 : index
    %c0_37 = arith.constant 0 : index
    %40 = vector.load %arg1[%c0_36, %c0_37] : memref<2x256xbf16, #tpu.memory_space<vmem>>, vector<1x256xbf16>
    %41 = vector.broadcast %40 : vector<1x256xbf16> to vector<8x256xbf16>
    %42 = arith.mulf %39, %41 : vector<8x256xbf16>
    %c48 = arith.constant 48 : index
    %c0_38 = arith.constant 0 : index
    %43 = vector.load %arg10[%c48, %c0_38] : memref<144x256xbf16, #tpu.memory_space<vmem>>, vector<8x256xbf16>
    tpu.vector_store %arg10[%c48, %c0_38], %42 {strides = array<i32>} : memref<144x256xbf16, #tpu.memory_space<vmem>>, vector<8x256xbf16>,
    %c0_39 = arith.constant 0 : index
    %c33 = arith.constant 33 : index
    %44 = vector.load %arg8[%c0_39, %c33] : memref<8x290xbf16, #tpu.memory_space<vmem>>, vector<8x256xbf16>
    %c56 = arith.constant 56 : index
    %c0_40 = arith.constant 0 : index
    %45 = vector.load %arg10[%c56, %c0_40] : memref<144x256xbf16, #tpu.memory_space<vmem>>, vector<8x256xbf16>
    tpu.vector_store %arg10[%c56, %c0_40], %44 {strides = array<i32>} : memref<144x256xbf16, #tpu.memory_space<vmem>>, vector<8x256xbf16>,
    %c0_41 = arith.constant 0 : index
    %c34 = arith.constant 34 : index
    %46 = vector.load %arg8[%c0_41, %c34] : memref<8x290xbf16, #tpu.memory_space<vmem>>, vector<8x256xbf16>
    %c1_42 = arith.constant 1 : index
    %c0_43 = arith.constant 0 : index
    %47 = vector.load %arg1[%c1_42, %c0_43] : memref<2x256xbf16, #tpu.memory_space<vmem>>, vector<1x256xbf16>
    %48 = vector.broadcast %47 : vector<1x256xbf16> to vector<8x256xbf16>
    %49 = arith.mulf %46, %48 : vector<8x256xbf16>
    %c64 = arith.constant 64 : index
    %c0_44 = arith.constant 0 : index
    %50 = vector.load %arg10[%c64, %c0_44] : memref<144x256xbf16, #tpu.memory_space<vmem>>, vector<8x256xbf16>
    tpu.vector_store %arg10[%c64, %c0_44], %49 {strides = array<i32>} : memref<144x256xbf16, #tpu.memory_space<vmem>>, vector<8x256xbf16>,
    %cst_45 = arith.constant 0.000000e+00 : bf16
    %51 = vector.broadcast %cst_45 : bf16 to vector<8x290xbf16>
    %c0_46 = arith.constant 0 : index
    %c0_47 = arith.constant 0 : index
    %52 = vector.load %arg9[%c0_46, %c0_47] : memref<8x290xbf16, #tpu.memory_space<vmem>>, vector<8x290xbf16>
    tpu.vector_store %arg9[%c0_46, %c0_47], %51 {strides = array<i32>} : memref<8x290xbf16, #tpu.memory_space<vmem>>, vector<8x290xbf16>,
    %c8_48 = arith.constant 8 : index
    %c0_49 = arith.constant 0 : index
    %53 = vector.load %arg2[%c8_48, %c0_49] : memref<16x1xf32, #tpu.memory_space<vmem>>, vector<8x1xf32>
    %c8_50 = arith.constant 8 : index
    %c0_51 = arith.constant 0 : index
    %54 = vector.load %arg3[%c8_50, %c0_51] : memref<16x1xf32, #tpu.memory_space<vmem>>, vector<8x1xf32>
    %c0_52 = arith.constant 0 : index
    %c0_53 = arith.constant 0 : index
    %c0_54 = arith.constant 0 : index
    %55 = vector.load %arg6[%c0_52, %c0_53, %c0_54] : memref<1x8x256xf32, #tpu.memory_space<vmem>>, vector<1x8x256xf32>
    %56 = vector.shape_cast %55 : vector<1x8x256xf32> to vector<8x256xf32>
    %57 = vector.broadcast %53 : vector<8x1xf32> to vector<8x256xf32>
    %58 = arith.mulf %56, %57 : vector<8x256xf32>
    %59 = vector.broadcast %54 : vector<8x1xf32> to vector<8x256xf32>
    %60 = arith.addf %58, %59 : vector<8x256xf32>
    %cst_55 = arith.constant 0.000000e+00 : f32
    %61 = vector.broadcast %cst_55 : f32 to vector<8x256xf32>
    %62 = arith.maximumf %60, %61 : vector<8x256xf32>
    %63 = arith.truncf %62 : vector<8x256xf32> to vector<8x256xbf16>
    %c0_56 = arith.constant 0 : index
    %c17_57 = arith.constant 17 : index
    %64 = vector.load %arg9[%c0_56, %c17_57] : memref<8x290xbf16, #tpu.memory_space<vmem>>, vector<8x256xbf16>
    tpu.vector_store %arg9[%c0_56, %c17_57], %63 {strides = array<i32>} : memref<8x290xbf16, #tpu.memory_space<vmem>>, vector<8x256xbf16>,
    %c0_58 = arith.constant 0 : index
    %c0_59 = arith.constant 0 : index
    %65 = vector.load %arg9[%c0_58, %c0_59] : memref<8x290xbf16, #tpu.memory_space<vmem>>, vector<8x256xbf16>
    %c0_60 = arith.constant 0 : index
    %c0_61 = arith.constant 0 : index
    %66 = vector.load %arg1[%c0_60, %c0_61] : memref<2x256xbf16, #tpu.memory_space<vmem>>, vector<1x256xbf16>
    %67 = vector.broadcast %66 : vector<1x256xbf16> to vector<8x256xbf16>
    %68 = arith.mulf %65, %67 : vector<8x256xbf16>
    %c72 = arith.constant 72 : index
    %c0_62 = arith.constant 0 : index
    %69 = vector.load %arg10[%c72, %c0_62] : memref<144x256xbf16, #tpu.memory_space<vmem>>, vector<8x256xbf16>
    tpu.vector_store %arg10[%c72, %c0_62], %68 {strides = array<i32>} : memref<144x256xbf16, #tpu.memory_space<vmem>>, vector<8x256xbf16>,
    %c0_63 = arith.constant 0 : index
    %c1_64 = arith.constant 1 : index
    %70 = vector.load %arg9[%c0_63, %c1_64] : memref<8x290xbf16, #tpu.memory_space<vmem>>, vector<8x256xbf16>
    %c80 = arith.constant 80 : index
    %c0_65 = arith.constant 0 : index
    %71 = vector.load %arg10[%c80, %c0_65] : memref<144x256xbf16, #tpu.memory_space<vmem>>, vector<8x256xbf16>
    tpu.vector_store %arg10[%c80, %c0_65], %70 {strides = array<i32>} : memref<144x256xbf16, #tpu.memory_space<vmem>>, vector<8x256xbf16>,
    %c0_66 = arith.constant 0 : index
    %c2_67 = arith.constant 2 : index
    %72 = vector.load %arg9[%c0_66, %c2_67] : memref<8x290xbf16, #tpu.memory_space<vmem>>, vector<8x256xbf16>
    %c1_68 = arith.constant 1 : index
    %c0_69 = arith.constant 0 : index
    %73 = vector.load %arg1[%c1_68, %c0_69] : memref<2x256xbf16, #tpu.memory_space<vmem>>, vector<1x256xbf16>
    %74 = vector.broadcast %73 : vector<1x256xbf16> to vector<8x256xbf16>
    %75 = arith.mulf %72, %74 : vector<8x256xbf16>
    %c88 = arith.constant 88 : index
    %c0_70 = arith.constant 0 : index
    %76 = vector.load %arg10[%c88, %c0_70] : memref<144x256xbf16, #tpu.memory_space<vmem>>, vector<8x256xbf16>
    tpu.vector_store %arg10[%c88, %c0_70], %75 {strides = array<i32>} : memref<144x256xbf16, #tpu.memory_space<vmem>>, vector<8x256xbf16>,
    %c0_71 = arith.constant 0 : index
    %c16_72 = arith.constant 16 : index
    %77 = vector.load %arg9[%c0_71, %c16_72] : memref<8x290xbf16, #tpu.memory_space<vmem>>, vector<8x256xbf16>
    %c0_73 = arith.constant 0 : index
    %c0_74 = arith.constant 0 : index
    %78 = vector.load %arg1[%c0_73, %c0_74] : memref<2x256xbf16, #tpu.memory_space<vmem>>, vector<1x256xbf16>
    %79 = vector.broadcast %78 : vector<1x256xbf16> to vector<8x256xbf16>
    %80 = arith.mulf %77, %79 : vector<8x256xbf16>
    %c96 = arith.constant 96 : index
    %c0_75 = arith.constant 0 : index
    %81 = vector.load %arg10[%c96, %c0_75] : memref<144x256xbf16, #tpu.memory_space<vmem>>, vector<8x256xbf16>
    tpu.vector_store %arg10[%c96, %c0_75], %80 {strides = array<i32>} : memref<144x256xbf16, #tpu.memory_space<vmem>>, vector<8x256xbf16>,
    %c0_76 = arith.constant 0 : index
    %c17_77 = arith.constant 17 : index
    %82 = vector.load %arg9[%c0_76, %c17_77] : memref<8x290xbf16, #tpu.memory_space<vmem>>, vector<8x256xbf16>
    %c104 = arith.constant 104 : index
    %c0_78 = arith.constant 0 : index
    %83 = vector.load %arg10[%c104, %c0_78] : memref<144x256xbf16, #tpu.memory_space<vmem>>, vector<8x256xbf16>
    tpu.vector_store %arg10[%c104, %c0_78], %82 {strides = array<i32>} : memref<144x256xbf16, #tpu.memory_space<vmem>>, vector<8x256xbf16>,
    %c0_79 = arith.constant 0 : index
    %c18_80 = arith.constant 18 : index
    %84 = vector.load %arg9[%c0_79, %c18_80] : memref<8x290xbf16, #tpu.memory_space<vmem>>, vector<8x256xbf16>
    %c1_81 = arith.constant 1 : index
    %c0_82 = arith.constant 0 : index
    %85 = vector.load %arg1[%c1_81, %c0_82] : memref<2x256xbf16, #tpu.memory_space<vmem>>, vector<1x256xbf16>
    %86 = vector.broadcast %85 : vector<1x256xbf16> to vector<8x256xbf16>
    %87 = arith.mulf %84, %86 : vector<8x256xbf16>
    %c112 = arith.constant 112 : index
    %c0_83 = arith.constant 0 : index
    %88 = vector.load %arg10[%c112, %c0_83] : memref<144x256xbf16, #tpu.memory_space<vmem>>, vector<8x256xbf16>
    tpu.vector_store %arg10[%c112, %c0_83], %87 {strides = array<i32>} : memref<144x256xbf16, #tpu.memory_space<vmem>>, vector<8x256xbf16>,
    %c0_84 = arith.constant 0 : index
    %c32_85 = arith.constant 32 : index
    %89 = vector.load %arg9[%c0_84, %c32_85] : memref<8x290xbf16, #tpu.memory_space<vmem>>, vector<8x256xbf16>
    %c0_86 = arith.constant 0 : index
    %c0_87 = arith.constant 0 : index
    %90 = vector.load %arg1[%c0_86, %c0_87] : memref<2x256xbf16, #tpu.memory_space<vmem>>, vector<1x256xbf16>
    %91 = vector.broadcast %90 : vector<1x256xbf16> to vector<8x256xbf16>
    %92 = arith.mulf %89, %91 : vector<8x256xbf16>
    %c120 = arith.constant 120 : index
    %c0_88 = arith.constant 0 : index
    %93 = vector.load %arg10[%c120, %c0_88] : memref<144x256xbf16, #tpu.memory_space<vmem>>, vector<8x256xbf16>
    tpu.vector_store %arg10[%c120, %c0_88], %92 {strides = array<i32>} : memref<144x256xbf16, #tpu.memory_space<vmem>>, vector<8x256xbf16>,
    %c0_89 = arith.constant 0 : index
    %c33_90 = arith.constant 33 : index
    %94 = vector.load %arg9[%c0_89, %c33_90] : memref<8x290xbf16, #tpu.memory_space<vmem>>, vector<8x256xbf16>
    %c128 = arith.constant 128 : index
    %c0_91 = arith.constant 0 : index
    %95 = vector.load %arg10[%c128, %c0_91] : memref<144x256xbf16, #tpu.memory_space<vmem>>, vector<8x256xbf16>
    tpu.vector_store %arg10[%c128, %c0_91], %94 {strides = array<i32>} : memref<144x256xbf16, #tpu.memory_space<vmem>>, vector<8x256xbf16>,
    %c0_92 = arith.constant 0 : index
    %c34_93 = arith.constant 34 : index
    %96 = vector.load %arg9[%c0_92, %c34_93] : memref<8x290xbf16, #tpu.memory_space<vmem>>, vector<8x256xbf16>
    %c1_94 = arith.constant 1 : index
    %c0_95 = arith.constant 0 : index
    %97 = vector.load %arg1[%c1_94, %c0_95] : memref<2x256xbf16, #tpu.memory_space<vmem>>, vector<1x256xbf16>
    %98 = vector.broadcast %97 : vector<1x256xbf16> to vector<8x256xbf16>
    %99 = arith.mulf %96, %98 : vector<8x256xbf16>
    %c136 = arith.constant 136 : index
    %c0_96 = arith.constant 0 : index
    %100 = vector.load %arg10[%c136, %c0_96] : memref<144x256xbf16, #tpu.memory_space<vmem>>, vector<8x256xbf16>
    tpu.vector_store %arg10[%c136, %c0_96], %99 {strides = array<i32>} : memref<144x256xbf16, #tpu.memory_space<vmem>>, vector<8x256xbf16>,
    %c0_97 = arith.constant 0 : index
    %c0_98 = arith.constant 0 : index
    %101 = vector.load %arg4[%c0_97, %c0_98] : memref<8x144xbf16, #tpu.memory_space<vmem>>, vector<8x144xbf16>
    %c0_99 = arith.constant 0 : index
    %c0_100 = arith.constant 0 : index
    %102 = vector.load %arg10[%c0_99, %c0_100] : memref<144x256xbf16, #tpu.memory_space<vmem>>, vector<144x256xbf16>
    %cst_101 = arith.constant dense<0.000000e+00> : vector<8x256xf32>
    %103 = tpu.matmul %101, %102, %cst_101 {dimension_numbers = #tpu.dot_dimension_numbers<[1], [0], [0], [1], [0, 0, 1, 1], [], []>} : vector<8x144xbf16>, vector<144x256xbf16>, vector<8x256xf32> -> vector<8x256xf32>
    %c0_102 = arith.constant 0 : index
    %c0_103 = arith.constant 0 : index
    %c0_104 = arith.constant 0 : index
    %104 = vector.load %arg7[%c0_102, %c0_103, %c0_104] : memref<1x8x256xf32, #tpu.memory_space<vmem>>, vector<1x8x256xf32>
    %105 = vector.shape_cast %104 : vector<1x8x256xf32> to vector<8x256xf32>
    %106 = vector.shape_cast %103 : vector<8x256xf32> to vector<1x8x256xf32>
    tpu.vector_store %arg7[%c0_102, %c0_103, %c0_104], %106 {strides = array<i32>} : memref<1x8x256xf32, #tpu.memory_space<vmem>>, vector<1x8x256xf32>,
    return
  }
  func.func @transform_0(%arg0: i32) -> (i32, i32) {
    %c0_i32 = arith.constant 0 : i32
    %c0_i32_0 = arith.constant 0 : i32
    %c0_i32_1 = arith.constant 0 : i32
    return %c0_i32, %c0_i32_0 : i32, i32
  }
  func.func @transform_1(%arg0: i32) -> (i32, i32) {
    %c0_i32 = arith.constant 0 : i32
    %c0_i32_0 = arith.constant 0 : i32
    %c0_i32_1 = arith.constant 0 : i32
    return %c0_i32, %c0_i32_0 : i32, i32
  }
  func.func @transform_2(%arg0: i32) -> (i32, i32) {
    %c0_i32 = arith.constant 0 : i32
    %c0_i32_0 = arith.constant 0 : i32
    %c0_i32_1 = arith.constant 0 : i32
    return %c0_i32, %c0_i32_0 : i32, i32
  }
  func.func @transform_3(%arg0: i32) -> (i32, i32) {
    %c0_i32 = arith.constant 0 : i32
    %c0_i32_0 = arith.constant 0 : i32
    %c0_i32_1 = arith.constant 0 : i32
    return %c0_i32, %c0_i32_0 : i32, i32
  }
  func.func @transform_4(%arg0: i32) -> (i32, i32, i32) {
    %c0_i32 = arith.constant 0 : i32
    %c0_i32_0 = arith.constant 0 : i32
    %c0_i32_1 = arith.constant 0 : i32
    return %arg0, %c0_i32, %c0_i32_0 : i32, i32, i32
  }
  func.func @transform_5(%arg0: i32) -> (i32, i32, i32) {
    %c0_i32 = arith.constant 0 : i32
    %c0_i32_0 = arith.constant 0 : i32
    %c0_i32_1 = arith.constant 0 : i32
    return %arg0, %c0_i32, %c0_i32_0 : i32, i32, i32
  }
  func.func @transform_6(%arg0: i32) -> (i32, i32, i32) {
    %c0_i32 = arith.constant 0 : i32
    %c0_i32_0 = arith.constant 0 : i32
    %c0_i32_1 = arith.constant 0 : i32
    return %arg0, %c0_i32, %c0_i32_0 : i32, i32, i32
  }
}

</mosaic_0001>

<bundles_post_ra>
// kernel: _conv2x_forward.2
= control target key start
LH: loop header
LB: loop body
LE: loop exit
PB: predicated region body
PF: predicated region fallthrough
CT: control target
= control target key end

     0   :  { %s1082_s27 = smov 0   ;;  %s1245_s0 = inlined_call_operand.vmem [shape: bf16[1,256], index: 0, kind: input, shape index: {}]   ;;  %s1246_s1 = inlined_call_operand.vmem [shape: f32[16,1], index: 1, kind: input, shape index: {}]   ;;  %s1247_s2 = inlined_call_operand.vmem [shape: f32[16,1], index: 2, kind: input, shape index: {}]   ;;  %s1248_s3 = inlined_call_operand.vmem [shape: bf16[8,36], index: 3, kind: input, shape index: {}]   ;;  %s1249_s4 = inlined_call_operand.vmem [shape: f32[2,4,256], index: 4, kind: input, shape index: {}]   ;;  %s1250_s5 = inlined_call_operand.vmem [shape: f32[2,4,256], index: 5, kind: input, shape index: {}]   ;;  %s1251_s6 = inlined_call_operand.vmem [shape: f32[2,4,256], index: 6, kind: input, shape index: {}]   ;;  %s1252_s7 = inlined_call_operand.vmem [shape: f32[2,4,256], index: 7, kind: input, shape index: {}]   ;;  %s1253_s8 = inlined_call_operand.vmem [shape: bf16[2,8,256], index: 8, kind: output, shape index: {}]  }
   0x1 LB: > { %s960_s28 = sadd.s32 4294967295, %s1028_s27   ;;  %p964_p0 = scmp.ge.s32.totalorder %s1028_s27, 1  ;;  %s1028_s27 = sphi %s1082_s27, %s18_s27  }
   0x2   : > { %p292_p1 = scmp.lt.s32.totalorder %s1028_s27, 3 }
   0x4   : > { %p293_p2 = pnand %p964_p0, %p292_p1 }
   0x5   : > { %p341_p3 = scmp.lt.s32.totalorder (!%p293_p2), %s960_s28, 1  ;;  %s1032_s17 = smov (!%p293_p2), 17  }
   0x6   : > { %296 = sbr.rel (%p293_p2) target bundleno = 1200 (0x4b0), region = 52  ;;  %s1033_s10 = smov (!%p293_p2), 16  }
   0x7   : > { %s1035_s25 = smov (!%p293_p2), 112  }
   0xb   : > { %v373_v0 = vld [vmem:[%s1246_s1] sm:$0xf]  ;;  %v1030_v1 = vmov 0   ;;  %s1257_s28 = smov (!%p341_p3, %s960_s28), 1  ;;  %v1031_v3 = vmov 839922192  }
   0xc   : > { %1019 = vset.pattern.permute.xlu0 %v1030_v1  ;;  %1020 = vset.pattern.permute.xlu1 %v1030_v1  ;;  %v374_v2 = vld [vmem:[%s1247_s2] sm:$0xf]  ;;  %v381_v4 = vunpack.c.l.s4 %v1031_v3  ;;  %s1096_s11 = sshll.u32 %s1257_s28, 3  ;;  %vm367_vm0 = vcmask 1041408   ;;  %v441_v14 = vld [vmem:[%s1247_s2 + $0x4] sm:$0xf] }
   0xd   : > { %378 = vperm.xlu0 %1019, %v373_v0   ;;  %1021 = vset.pattern.permute.xlu2 %v1030_v1  ;;  %s345_s14 = scalar_lea.vmem %s1249_s4, %s1096_s11  ;;  %vm368_vm1 = vcmask 1043458   ;;  %vm370_vm2 = vcmask 136196   ;;  %vm416_vm3 = vcmask 1041544   ;;  %v440_v21 = vld [vmem:[%s1246_s1 + $0x4] sm:$0xf]  ;;  %vm413_vm8 = vcmask 138240   ;;  %s350_s26 = scalar_lea.vmem %s1250_s5, %s1096_s11 }
   0xe   : > { %v1098_v6 = vunpack.c.0.s8 %v381_v4  ;;  %v375_v8 = vld [vmem:[%s345_s14] sm:$0xff]  ;;  %455 = vperm.xlu2 %1021, %v441_v14   ;;  %vm369_vm4 = vmor %vm368_vm1, %vm367_vm0  ;;  %v560_v22 = vld [vmem:[%s1246_s1 + $0x8] sm:$0xf]  ;;  %vm433_vm9 = vcmask 1043456   ;;  %s1034_s14 = smov 111   ;;  %vm507_vm10 = vcmask 130048   ;;  %s355_s18 = scalar_lea.vmem %s1251_s6, %s1096_s11 }
   0xf   : > { %vm371_vm5 = vmor %vm370_vm2, %vm369_vm4  ;;  %v641_v23 = vld [vmem:[%s1246_s1 + $0xc] sm:$0xf]  ;;  %v442_v28 = vld [vmem:[%s350_s26] sm:$0xff]  ;;  %s360_s21 = scalar_lea.vmem %s1252_s7, %s1096_s11  ;;  %vm435_vm11 = vcmask 908288   ;;  %s1036_s26 = smov 127   ;;  %vm537_vm12 = vcmask 916480  }
  0x10   : > { %372 = vst.msk [vmem:[#allocation2] sm:$0x3f] %vm371_vm5, %v1030_v1  ;;  %vm417_vm6 = vmor %vm368_vm1, %vm416_vm3  ;;  %v484_v38 = vld [vmem:[%s1245_s0] sm:$0x3]  ;;  %v561_v48 = vld [vmem:[%s1247_s2 + $0x8] sm:$0xf] }
  0x11   : > { %vm1110_vm7 = vmor %vm370_vm2, %vm417_vm6  ;;  %439 = vst.msk [vmem:[#allocation3] sm:$0x3f] %vm371_vm5, %v1030_v1  ;;  %v642_v55 = vld [vmem:[%s1247_s2 + $0xc] sm:$0xf]  ;;  %vm618_vm13 = vcmask 1039360   ;;  %vm831_vm14 = vcmask 293888  }
  0x12   : > { %559 = vst.msk [vmem:[#allocation4] sm:$0x3f] %vm371_vm5, %v1030_v1 }
  0x13   : > { %640 = vst.msk [vmem:[#allocation5] sm:$0x3f] %vm371_vm5, %v1030_v1 }
  0x15   : > { %388 = vperm.xlu0 %1019, %v374_v2  }
  0x68   : > { %v456_v27 = vpop.permute.xlu2 %455 }
  0x69   : > { %v460_v31 = vperm.slane %v456_v27, %v1098_v6 }
  0x7f   : > { %v379_v5 = vpop.permute.xlu0 %378 }
  0x80   : > { %v383_v7 = vperm.slane %v379_v5, %v1098_v6 }
  0x82   : > { %v385_v10 = vmul.f32 %v383_v7, %v375_v8  ;;  %v562_v7 = vld [vmem:[%s355_s18] sm:$0xff] }
  0x87   : > { %v389_v9 = vpop.permute.xlu0 %388 }
  0x88   : > { %v393_v11 = vperm.slane %v389_v9, %v1098_v6 }
  0x8a   : > { %v395_v12 = vadd.f32 %v393_v11, %v385_v10 }
  0x8c   : > { %v396_v13 = vmax.f32 %v395_v12, 0.0 }
  0x8e   : > { %398 = vst [vmem:[#allocation1] ss:$2 sm:$0xff] %v396_v13 }
  0x95   : > { %v399_v15 = vld.sshfl [vmem:[#allocation1] sm:$0xff pattern:$0x75316420]  ;;  %v400_v16 = vld.sshfl [vmem:[#allocation1 + $0x8] sm:$0xff pattern:$0x75316420] }
  0x96   : > { %v403_v17 = vpack.c.bf16 %v400_v16, %v399_v15 }
  0x98   : > { %v405_v19 = vrot.slane %v403_v17, 2 }
  0x9a   : > { %v408_v20 = vsel %vm367_vm0, %v403_v17, %v405_v19 }
  0x9b   : > { %410 = vrot.lane.b32.xlu1 %v408_v20, %s1032_s17 }
  0xa3   : > { %445 = vperm.xlu1 %1020, %v440_v21  }
  0xab   : > { %565 = vperm.xlu1 %1020, %v560_v22  }
  0xb3   : > { %646 = vperm.xlu1 %1020, %v641_v23  }
 0x10d   : > { %v411_v24 = vpop.permute.xlu1 %410 }
 0x10e   : > { %v412_v25 = vrot.slane %v411_v24, 6 }
 0x110   : > { %v414_v26 = vsel %vm413_vm8, %v412_v25, %v411_v24 }
 0x111   : > { %419 = vst.msk [vmem:[#allocation2] sm:$0x3f] %vm1110_vm7, %v414_v26 }
 0x115   : > { %v446_v29 = vpop.permute.xlu1 %445 }
 0x116   : > { %v450_v30 = vperm.slane %v446_v29, %v1098_v6 }
 0x118   : > { %v452_v32 = vmul.f32 %v450_v30, %v442_v28  ;;  %v420_v33 = vld [vmem:[#allocation2] sm:$0x3f]  ;;  %v643_v30 = vld [vmem:[%s360_s21] sm:$0xff] }
 0x119   : > { %422 = vst [vmem:[#allocation1] ss:$2 sm:$0xff] %v420_v33 }
 0x11a   : > { %v462_v34 = vadd.f32 %v460_v31, %v452_v32 }
 0x11c   : > { %v463_v35 = vmax.f32 %v462_v34, 0.0 }
 0x11d   : > { %v566_v3 = vpop.permute.xlu1 %565 }
 0x11e   : > { %v570_v5 = vperm.slane %v566_v3, %v1098_v6 }
 0x120   : > { %v1134_v36 = vld.sshfl [vmem:[#allocation1] sm:$0xff pattern:$0x75643120]  ;;  %v425_v37 = vld.sshfl [vmem:[#allocation1 + $0x8] sm:$0xff pattern:$0x75643120]  ;;  %v572_v12 = vmul.f32 %v570_v5, %v562_v7 }
 0x121   : > { %465 = vst [vmem:[#allocation1] ss:$2 sm:$0xff] %v463_v35 }
 0x125   : > { %v647_v27 = vpop.permute.xlu1 %646 }
 0x126   : > { %v651_v29 = vperm.slane %v647_v27, %v1098_v6 }
 0x128   : > { %v466_v39 = vld.sshfl [vmem:[#allocation1] sm:$0xff pattern:$0x75316420]  ;;  %v467_v40 = vld.sshfl [vmem:[#allocation1 + $0x8] sm:$0xff pattern:$0x75316420]  ;;  %v653_v35 = vmul.f32 %v651_v29, %v643_v30 }
 0x129   : > { %486 = vst [vmem:[#allocation1] ss:$9 sm:$0xff] %v484_v38  ;;  %v470_v41 = vpack.c.bf16 %v467_v40, %v466_v39 }
 0x12b   : > { %v472_v42 = vrot.slane %v470_v41, 2 }
 0x12d   : > { %v475_v43 = vsel %vm367_vm0, %v470_v41, %v472_v42  ;;  %v685_v41 = vld [vmem:[%s1245_s0] sm:$0x3] }
 0x12e   : > { %477 = vrot.lane.b32.xlu2 %v475_v43, %s1032_s17 }
 0x130   : > { %v488_v44 = vld [vmem:[#allocation1 + $0x9] sm:$0xff]  ;;  %v487_v45 = vld [vmem:[#allocation1] sm:$0xff] }
 0x131   : > { %v489_v46 = vpack.i.b16 %v487_v45, %v487_v45  ;;  %v492_v47 = vpack.i.b16 %v488_v44, %v488_v44 }
 0x133   : > { %v491_v49 = vperm.slane %v489_v46, 0  ;;  %v494_v50 = vperm.slane %v492_v47, 0 }
 0x135   : > { %v498_v51 = vunpack.c.l.bf16 %v494_v50  ;;  %v497_v52 = vunpack.c.l.bf16 %v491_v49 }
 0x136   : > { %575 = vperm.xlu2 %1021, %v561_v48  }
 0x137   : > { %v501_v53 = vrot.slane %v498_v51, 4 }
 0x139   : > { %v503_v54 = vsel %vm433_vm9, %v497_v52, %v501_v53 }
 0x13a   : > { %504 = vrot.lane.b32.xlu0 %v503_v54, %s1033_s10 }
 0x13e   : > { %656 = vperm.xlu2 %1021, %v642_v55  }
 0x146   : > { %429 = vrot.lane.b32.xlu2 %v425_v37, %s1034_s14 }
 0x188   : > { %v478_v56 = vpop.permute.xlu2 %477 }
 0x189   : > { %v479_v57 = vrot.slane %v478_v56, 6 }
 0x18b   : > { %v480_v58 = vsel %vm413_vm8, %v479_v57, %v478_v56 }
 0x18c   : > { %482 = vst.msk [vmem:[#allocation3] sm:$0x3f] %vm1110_vm7, %v480_v58 }
 0x190   : > { %v576_v4 = vpop.permute.xlu2 %575 }
 0x191   : > { %v580_v9 = vperm.slane %v576_v4, %v1098_v6 }
 0x193   : > { %v483_v59 = vld [vmem:[#allocation3] sm:$0x3f]  ;;  %v582_v13 = vadd.f32 %v580_v9, %v572_v12 }
 0x194   : > { %v496_v61 = vunpack.c.h.bf16 %v483_v59  ;;  %v495_v63 = vunpack.c.l.bf16 %v483_v59  ;;  %v541_v8 = vld [vmem:[#allocation3] sm:$0x3f] }
 0x195   : > { %v583_v14 = vmax.f32 %v582_v13, 0.0  ;;  %v731_v13 = vld [vmem:[%s1245_s0] sm:$0x3] }
 0x198   : > { %v657_v28 = vpop.permute.xlu2 %656 }
 0x199   : > { %v661_v31 = vperm.slane %v657_v28, %v1098_v6 }
 0x19b   : > { %v663_v37 = vadd.f32 %v661_v31, %v653_v35 }
 0x19d   : > { %v664_v38 = vmax.f32 %v663_v37, 0.0 }
 0x1a0   : > { %v430_v56 = vpop.permute.xlu2 %429 }
 0x1ac   : > { %v505_v60 = vpop.permute.xlu0 %504 }
 0x1ad   : > { %v506_v62 = vrot.slane %v505_v60, 4 }
 0x1af   : > { %v508_v0 = vsel %vm507_vm10, %v506_v62, %v505_v60  ;;  %v512_v1 = vmul.f32 %v506_v62, %v496_v61 }
 0x1b0   : > { %v511_v2 = vmul.f32 %v508_v0, %v495_v63 }
 0x1b1   : > { %517 = vst [vmem:[#allocation1 + $0x10] ss:$2 sm:$0xff] %v512_v1 }
 0x1b2   : > { %515 = vst [vmem:[#allocation1] ss:$2 sm:$0xff] %v511_v2 }
 0x1b8   : > { %v1185_v42 = vld.sshfl [vmem:[#allocation1 + $0x10] sm:$0xff pattern:$0x75316420] }
 0x1b9   : > { %v1160_v10 = vld.sshfl [vmem:[#allocation1] sm:$0xff pattern:$0x75316420]  ;;  %v1162_v11 = vld.sshfl [vmem:[#allocation1 + $0x8] sm:$0xff pattern:$0x75316420] }
 0x1ba   : > { %544 = vst [vmem:[#allocation1 + $0x1] ss:$2 sm:$0xff] %v541_v8 }
 0x1c1   : > { %v545_v15 = vld.sshfl [vmem:[#allocation1] sm:$0xff pattern:$0x75643120]  ;;  %v1164_v16 = vld.sshfl [vmem:[#allocation1 + $0x8] sm:$0xff pattern:$0x75643120] }
 0x1c2   : > { %585 = vst [vmem:[#allocation1] ss:$2 sm:$0xff] %v583_v14 }
 0x1c9   : > { %v586_v17 = vld.sshfl [vmem:[#allocation1] sm:$0xff pattern:$0x75316420]  ;;  %v587_v19 = vld.sshfl [vmem:[#allocation1 + $0x8] sm:$0xff pattern:$0x75316420] }
 0x1ca   : > { %v590_v20 = vpack.c.bf16 %v587_v19, %v586_v17 }
 0x1cc   : > { %v592_v21 = vrot.slane %v590_v20, 2 }
 0x1ce   : > { %v595_v22 = vsel %vm367_vm0, %v590_v20, %v592_v21 }
 0x1cf   : > { %597 = vrot.lane.b32.xlu0 %v595_v22, %s1032_s17 }
 0x241   : > { %v598_v23 = vpop.permute.xlu0 %597 }
 0x242   : > { %v599_v24 = vrot.slane %v598_v23, 6 }
 0x244   : > { %v600_v25 = vsel %vm413_vm8, %v599_v24, %v598_v23 }
 0x245   : > { %602 = vst.msk [vmem:[#allocation4] sm:$0x3f] %vm1110_vm7, %v600_v25 }
 0x24c   : > { %v603_v26 = vld [vmem:[#allocation4] sm:$0x3f] }
 0x24d   : > { %606 = vst [vmem:[#allocation1 + $0x1] ss:$2 sm:$0xff] %v603_v26  ;;  %v622_v32 = vld [vmem:[#allocation4] sm:$0x3f] }
 0x254   : > { %v1177_v33 = vld.sshfl [vmem:[#allocation1] sm:$0xff pattern:$0x75643120]  ;;  %v1179_v34 = vld.sshfl [vmem:[#allocation1 + $0x8] sm:$0xff pattern:$0x75643120] }
 0x255   : > { %625 = vst [vmem:[#allocation1 + $0x1] ss:$2 sm:$0xff] %v622_v32 }
 0x25c   : > { %v628_v39 = vld.sshfl [vmem:[#allocation1 + $0x8] sm:$0xff pattern:$0x75643120]  ;;  %v626_v40 = vld.sshfl [vmem:[#allocation1] sm:$0xff pattern:$0x75643120] }
 0x25d   : > { %630 = vrot.lane.b32.xlu2 %v626_v40, %s1034_s14  ;;  %666 = vst [vmem:[#allocation1] ss:$2 sm:$0xff] %v664_v38  ;;  %v432_v40 = vrot.slane %v430_v56, 4 }
 0x264   : > { %v667_v6 = vld.sshfl [vmem:[#allocation1] sm:$0xff pattern:$0x75316420]  ;;  %v668_v43 = vld.sshfl [vmem:[#allocation1 + $0x8] sm:$0xff pattern:$0x75316420] }
 0x265   : > { %v671_v44 = vpack.c.bf16 %v668_v43, %v667_v6  ;;  %687 = vst [vmem:[#allocation1] ss:$9 sm:$0xff] %v685_v41 }
 0x267   : > { %v673_v45 = vrot.slane %v671_v44, 2 }
 0x269   : > { %v676_v46 = vsel %vm367_vm0, %v671_v44, %v673_v45 }
 0x26a   : > { %678 = vrot.lane.b32.xlu0 %v676_v46, %s1032_s17 }
 0x26c   : > { %v689_v47 = vld [vmem:[#allocation1 + $0x9] sm:$0xff]  ;;  %v688_v49 = vld [vmem:[#allocation1] sm:$0xff] }
 0x26d   : > { %v693_v48 = vpack.i.b16 %v689_v47, %v689_v47  ;;  %v690_v53 = vpack.i.b16 %v688_v49, %v688_v49 }
 0x26f   : > { %v695_v51 = vperm.slane %v693_v48, 0  ;;  %v692_v57 = vperm.slane %v690_v53, 0 }
 0x271   : > { %v698_v55 = vunpack.c.l.bf16 %v695_v51  ;;  %v697_v60 = vunpack.c.l.bf16 %v692_v57  ;;  %v524_v57 = vpack.c.bf16 %v1162_v11, %v1160_v10 }
 0x272   : > { %549 = vrot.lane.b32.xlu0 %v545_v15, %s1034_s14 }
 0x273   : > { %v701_v59 = vrot.slane %v698_v55, 4 }
 0x275   : > { %v702_v63 = vsel %vm433_vm9, %v697_v60, %v701_v59  ;;  %v528_v59 = vrot.slane %v524_v57, 6 }
 0x27a   : > { %632 = vrot.lane.b32.xlu0 %v628_v39, %s1034_s14 }
 0x2b7   : > { %v631_v0 = vpop.permute.xlu2 %630 }
 0x2b8   : > { %v634_v3 = vrot.slane %v631_v0, 4 }
 0x2dc   : > { %v679_v50 = vpop.permute.xlu0 %678 }
 0x2dd   : > { %v680_v52 = vrot.slane %v679_v50, 6 }
 0x2df   : > { %v681_v54 = vsel %vm413_vm8, %v680_v52, %v679_v50  ;;  %v525_v52 = vpack.c.bf16 %v1185_v42, %v1185_v42 }
 0x2e0   : > { %683 = vst.msk [vmem:[#allocation5] sm:$0x3f] %vm1110_vm7, %v681_v54 }
 0x2e1   : > { %v529_v56 = vrot.slane %v525_v52, 6 }
 0x2e4   : > { %v1194_v58 = vpop.permute.xlu0 %549 }
 0x2e5   : > { %v553_v49 = vrot.slane %v1194_v58, 4 }
 0x2e7   : > { %v684_v61 = vld [vmem:[#allocation5] sm:$0xf] }
 0x2e8   : > { %v696_v62 = vunpack.c.l.bf16 %v684_v61  ;;  %v713_v7 = vld [vmem:[#allocation5] sm:$0x3f] }
 0x2e9   : > { %v730_v28 = vld [vmem:[#allocation5] sm:$0x3f] }
 0x2ea   : > { %v704_v1 = vmul.f32 %v702_v63, %v696_v62  ;;  %v743_v30 = vunpack.c.h.bf16 %v730_v28  ;;  %v742_v32 = vunpack.c.l.bf16 %v730_v28  ;;  %v783_v45 = vld [vmem:[#allocation5] sm:$0x3f] }
 0x2ec   : > { %706 = vst [vmem:[#allocation1] ss:$2 sm:$0xff] %v704_v1  ;;  %v633_v2 = vpop.permute.xlu0 %632 }
 0x2ed   : > { %v635_v4 = vrot.slane %v633_v2, 4 }
 0x2ef   : > { %v636_v18 = vsel %vm433_vm9, %v634_v3, %v635_v4 }
 0x2f0   : > { %v637_v5 = vsel %vm435_vm11, %v631_v0, %v636_v18 }
 0x2f1   : > { %639 = vst [vmem:[#allocation6 + $0x18] sm:$0xcc] %v637_v5 }
 0x2f3   : > { %v707_v8 = vld.sshfl [vmem:[#allocation1] sm:$0xff pattern:$0x75316420]  ;;  %v708_v9 = vld.sshfl [vmem:[#allocation1 + $0x8] sm:$0xff pattern:$0x75316420] }
 0x2f4   : > { %715 = vst [vmem:[#allocation1] ss:$2 sm:$0xff] %v713_v7  ;;  %v711_v12 = vpack.c.bf16 %v708_v9, %v707_v8 }
 0x2f6   : > { %712 = vst [vmem:[#allocation6] sm:$0x33] %v711_v12 }
 0x2fb   : > { %v716_v14 = vld.sshfl [vmem:[#allocation1] sm:$0xff pattern:$0x75643120]  ;;  %v718_v15 = vld.sshfl [vmem:[#allocation1 + $0x8] sm:$0xff pattern:$0x75643120] }
 0x2fc   : > { %733 = vst [vmem:[#allocation1] ss:$9 sm:$0xff] %v731_v13 }
 0x303   : > { %v734_v17 = vld [vmem:[#allocation1] sm:$0xff]  ;;  %v735_v19 = vld [vmem:[#allocation1 + $0x9] sm:$0xff] }
 0x304   : > { %v736_v20 = vpack.i.b16 %v734_v17, %v734_v17  ;;  %v739_v21 = vpack.i.b16 %v735_v19, %v735_v19 }
 0x306   : > { %v738_v22 = vperm.slane %v736_v20, 0  ;;  %v741_v23 = vperm.slane %v739_v21, 0 }
 0x308   : > { %v745_v24 = vunpack.c.l.bf16 %v741_v23  ;;  %v744_v25 = vunpack.c.l.bf16 %v738_v22 }
 0x30a   : > { %v748_v26 = vrot.slane %v745_v24, 4 }
 0x30c   : > { %v749_v27 = vsel %vm433_vm9, %v744_v25, %v748_v26 }
 0x30d   : > { %750 = vrot.lane.b32.xlu1 %v749_v27, %s1033_s10  ;;  %s365_s10 = scalar_lea.vmem %s1253_s8, %s1096_s11 }
 0x315   : > { %427 = vrot.lane.b32.xlu1 %v1134_v36, %s1034_s14 }
 0x31d   : > { %551 = vrot.lane.b32.xlu1 %v1164_v16, %s1034_s14 }
 0x37f   : > { %v751_v29 = vpop.permute.xlu1 %750 }
 0x380   : > { %v752_v31 = vrot.slane %v751_v29, 4 }
 0x382   : > { %v753_v35 = vsel %vm507_vm10, %v752_v31, %v751_v29  ;;  %v757_v37 = vmul.f32 %v752_v31, %v743_v30 }
 0x383   : > { %v756_v38 = vmul.f32 %v753_v35, %v742_v32 }
 0x384   : > { %762 = vst [vmem:[#allocation1 + $0x10] ss:$2 sm:$0xff] %v757_v37 }
 0x385   : > { %760 = vst [vmem:[#allocation1] ss:$2 sm:$0xff] %v756_v38 }
 0x387   : > { %v428_v39 = vpop.permute.xlu1 %427 }
 0x388   : > { %v431_v41 = vrot.slane %v428_v39, 4 }
 0x38a   : > { %v434_v6 = vsel %vm433_vm9, %v431_v41, %v432_v40 }
 0x38b   : > { %v436_v36 = vsel %vm435_vm11, %v428_v39, %v434_v6  ;;  %v765_v43 = vld.sshfl [vmem:[#allocation1 + $0x10] sm:$0xff pattern:$0x75316420] }
 0x38c   : > { %438 = vst [vmem:[#allocation6 + $0x10] sm:$0x33] %v436_v36  ;;  %v770_v16 = vpack.c.bf16 %v765_v43, %v765_v43  ;;  %v763_v44 = vld.sshfl [vmem:[#allocation1] sm:$0xff pattern:$0x75316420] }
 0x38d   : > { %v764_v46 = vld.sshfl [vmem:[#allocation1 + $0x8] sm:$0xff pattern:$0x75316420] }
 0x38e   : > { %775 = vrot.lane.b32.xlu2 %v770_v16, %s1035_s25  ;;  %v769_v47 = vpack.c.bf16 %v764_v46, %v763_v44  ;;  %785 = vst [vmem:[#allocation1] ss:$2 sm:$0xff] %v783_v45  ;;  %v800_v44 = vld [vmem:[%s1248_s3] sm:$0xf] }
 0x38f   : > { %v552_v48 = vpop.permute.xlu1 %551 }
 0x390   : > { %773 = vrot.lane.b32.xlu1 %v769_v47, %s1035_s25  ;;  %v554_v50 = vrot.slane %v552_v48, 4 }
 0x392   : > { %v555_v51 = vsel %vm433_vm9, %v553_v49, %v554_v50 }
 0x393   : > { %v556_v53 = vsel %vm435_vm11, %v1194_v58, %v555_v51 }
 0x394   : > { %558 = vst [vmem:[#allocation6 + $0x10] sm:$0xcc] %v556_v53 }
 0x395   : > { %v788_v54 = vld.sshfl [vmem:[#allocation1 + $0x8] sm:$0xff pattern:$0x75643120]  ;;  %v786_v55 = vld.sshfl [vmem:[#allocation1] sm:$0xff pattern:$0x75643120] }
 0x396   : > { %792 = vrot.lane.b32.xlu0 %v788_v54, %s1034_s14  ;;  %790 = vrot.lane.b32.xlu2 %v786_v55, %s1034_s14 }
 0x398   : > { %532 = vrot.lane.b32.xlu1 %v529_v56, %s1035_s25 }
 0x39b   : > { %v985_v32 = vld [vmem:[#allocation6 + $0x10] sm:$0xf]  ;;  %v1002_v35 = vld [vmem:[#allocation6 + $0x14] sm:$0xf] }
 0x39e   : > { %530 = vrot.lane.b32.xlu0 %v528_v59, %s1035_s25  ;;  %611 = vrot.lane.b32.xlu2 %v1177_v33, %s1036_s26 }
 0x3a0   : > { %720 = vrot.lane.b32.xlu1 %v716_v14, %s1036_s26 }
 0x3a6   : > { %613 = vrot.lane.b32.xlu0 %v1179_v34, %s1036_s26  ;;  %722 = vrot.lane.b32.xlu2 %v718_v15, %s1036_s26 }
 0x3e8   : > { %v776_v42 = vpop.permute.xlu2 %775 }
 0x3e9   : > { %v778_v61 = vrot.slane %v776_v42, 4 }
 0x3f0   : > { %v791_v58 = vpop.permute.xlu2 %790 }
 0x3f1   : > { %v794_v1 = vrot.slane %v791_v58, 4 }
 0x3f8   : > { %v612_v0 = vpop.permute.xlu2 %611 }
 0x3f9   : > { %v615_v26 = vrot.slane %v612_v0, 4 }
 0x400   : > { %v723_v4 = vpop.permute.xlu2 %722 }
 0x401   : > { %v725_v9 = vrot.slane %v723_v4, 4 }
 0x402   : > { %v774_v60 = vpop.permute.xlu1 %773 }
 0x403   : > { %v777_v62 = vrot.slane %v774_v60, 4 }
 0x405   : > { %v779_v63 = vsel %vm433_vm9, %v777_v62, %v778_v61 }
 0x406   : > { %v780_v10 = vsel %vm537_vm12, %v774_v60, %v779_v63 }
 0x407   : > { %782 = vst [vmem:[#allocation6 + $0x18] sm:$0x33] %v780_v10 }
 0x408   : > { %v793_v11 = vpop.permute.xlu0 %792 }
 0x409   : > { %v795_v2 = vrot.slane %v793_v11, 4 }
 0x40a   : > { %v533_v33 = vpop.permute.xlu1 %532 }
 0x40b   : > { %v796_v3 = vsel %vm433_vm9, %v794_v1, %v795_v2  ;;  %v535_v5 = vrot.slane %v533_v33, 4 }
 0x40c   : > { %v797_v34 = vsel %vm435_vm11, %v791_v58, %v796_v3 }
 0x40d   : > { %799 = vst [vmem:[#allocation6 + $0x20] sm:$0x33] %v797_v34 }
 0x40e   : > { %v1003_v25 = vld [vmem:[#allocation6 + $0x14] sm:$0xf0]  ;;  %v987_v30 = vld [vmem:[#allocation6 + $0x18] sm:$0xf0] }
 0x40f   : > { %v986_v38 = vor.u32 %v1003_v25, %v985_v32  ;;  %v990_v39 = vor.u32 %v1002_v35, %v987_v30 }
 0x410   : > { %v531_v18 = vpop.permute.xlu0 %530 }
 0x411   : > { %v534_v7 = vrot.slane %v531_v18, 4 }
 0x412   : > { %v721_v8 = vpop.permute.xlu1 %720 }
 0x413   : > { %v536_v12 = vsel %vm433_vm9, %v534_v7, %v535_v5  ;;  %v724_v13 = vrot.slane %v721_v8, 4 }
 0x414   : > { %v538_v14 = vsel %vm537_vm12, %v531_v18, %v536_v12  ;;  %v805_v15 = vld [vmem:[#allocation6 + $0x20] sm:$0x33] }
 0x415   : > { %540 = vst [vmem:[#allocation6 + $0x8] sm:$0xcc] %v538_v14  ;;  %v726_v17 = vsel %vm433_vm9, %v724_v13, %v725_v9  ;;  %v819_v19 = vunpack.c.l.b16 %v805_v15  ;;  %v820_v20 = vunpack.c.h.b16 %v805_v15 }
 0x416   : > { %v727_v21 = vsel %vm618_vm13, %v721_v8, %v726_v17 }
 0x417   : > { %729 = vst [vmem:[#allocation6 + $0x8] sm:$0x33] %v727_v21  ;;  %v825_v22 = vpack.c.b16 %v819_v19, %v819_v19  ;;  %v826_v23 = vpack.c.b16 %v820_v20, %v820_v20 }
 0x418   : > { %v614_v24 = vpop.permute.xlu0 %613 }
 0x419   : > { %v616_v27 = vrot.slane %v614_v24, 4  ;;  %v836_v28 = vsel %vm367_vm0, %v825_v22, 0  ;;  %v839_v29 = vsel %vm367_vm0, %v826_v23, 0 }
 0x41a   : > { %846 = vmatpush.bf16.msra.mxu0 %v836_v28  ;;  %859 = vmatpush.bf16.msra.mxu1 %v839_v29 }
 0x41b   : > { %v617_v31 = vsel %vm433_vm9, %v615_v26, %v616_v27 }
 0x41c   : > { %v619_v37 = vsel %vm618_vm13, %v612_v0, %v617_v31 }
 0x41d   : > { %621 = vst [vmem:[#allocation6] sm:$0xcc] %v619_v37 }
 0x41e   : > { %847 = vmatpush.bf16.msra.mxu0 %v986_v38  ;;  %860 = vmatpush.bf16.msra.mxu1 %v990_v39  ;;  %v1001_v40 = vld [vmem:[#allocation6 + $0x4] sm:$0xf0]  ;;  %v979_v36 = vld [vmem:[#allocation6 + $0x8] sm:$0xf0] }
 0x424   : > { %v977_v41 = vld [vmem:[#allocation6] sm:$0xf]  ;;  %v1000_v6 = vld [vmem:[#allocation6 + $0x4] sm:$0xf] }
 0x425   : > { %v978_v43 = vor.u32 %v1001_v40, %v977_v41  ;;  %v982_v16 = vor.u32 %v1000_v6, %v979_v36 }
 0x427   : > { %848 = vmatpush.bf16.msra.mxu0 %v978_v43  ;;  %861 = vmatpush.bf16.msra.mxu1 %v982_v16 }
 0x42a   : > { %991 = vmatmul.msk.bf16.vlgmr.msra.gmra.mxu0 %vm831_vm14, %v800_v44  ;;  %992 = vmatmul.msk.bf16.vlgmr.msra.gmra.mxu1 %vm831_vm14, %v800_v44 }
 0x4a7   : > { %v850_v45 = vpop.f32.mrf.mxu0  ;;  %v863_v46 = vpop.f32.mrf.mxu1 }
 0x4a8   : > { %v867_v47 = vpack.c.bf16 %v863_v46, %v850_v45 }
 0x4aa   : > { %868 = vst [vmem:[%s365_s10] sm:$0xff] %v867_v47 }
 0x4af   : > { %v852_v48 = vpop.f32.mrf.mxu0  ;;  %v865_v49 = vpop.f32.mrf.mxu1 }
 0x4b0 PF: > { %s18_s27 = sadd.s32 1, %s1028_s27  }
 0x4b1   : > { %p15_p4 = scmp.ge.s32.totalorder %s18_s27, 4  }
 0x4b3   :  { %17 = sbr.rel (!%p15_p4) target bundleno = 1 (0x1), region = 96 }

// kernel: _conv2x_forward.3
= control target key start
LH: loop header
LB: loop body
LE: loop exit
PB: predicated region body
PF: predicated region fallthrough
CT: control target
= control target key end

     0   :  { %s1424_s21 = smov 0   ;;  %s1745_s0 = inlined_call_operand.vmem [shape: bf16[2,256], index: 0, kind: input, shape index: {}]   ;;  %s1746_s1 = inlined_call_operand.vmem [shape: f32[16,1], index: 1, kind: input, shape index: {}]   ;;  %s1747_s2 = inlined_call_operand.vmem [shape: f32[16,1], index: 2, kind: input, shape index: {}]   ;;  %s1748_s3 = inlined_call_operand.vmem [shape: bf16[8,144], index: 3, kind: input, shape index: {}]   ;;  %s1749_s4 = inlined_call_operand.vmem [shape: bf16[2,8,256], index: 4, kind: input, shape index: {}]   ;;  %s1750_s5 = inlined_call_operand.vmem [shape: f32[2,8,256], index: 5, kind: input, shape index: {}]   ;;  %s1751_s6 = inlined_call_operand.vmem [shape: f32[2,8,256], index: 6, kind: output, shape index: {}]  }
   0x1 LB: > { %s1183_s22 = sadd.s32 4294967295, %s1372_s21   ;;  %p1187_p0 = scmp.ge.s32.totalorder %s1372_s21, 1  ;;  %s1372_s21 = sphi %s1424_s21, %s16_s21  }
   0x2   : > { %p222_p1 = scmp.lt.s32.totalorder %s1372_s21, 3 }
   0x4   : > { %p223_p2 = pnand %p1187_p0, %p222_p1 }
   0x5   : > { %s1375_s17 = smov (!%p223_p2), 2   ;;  %s1376_s20 = smov (!%p223_p2), 18  }
   0x6   : > { %226 = sbr.rel (%p223_p2) target bundleno = 597 (0x255), region = 44  ;;  %s1377_s25 = smov (!%p223_p2), 16  }
   0x7   : > { %s1378_s28 = smov (!%p223_p2), 34   ;;  %s1379_s7 = smov (!%p223_p2), 32  }
   0x8   : > { %p257_p3 = scmp.lt.s32.totalorder (!%p223_p2), %s1183_s22, 1  ;;  %s1380_s24 = smov (!%p223_p2), 17  }
   0x9   : > { %s1382_s26 = smov (!%p223_p2), 111   ;;  %s1383_s27 = smov (!%p223_p2), 95  }
   0xa   : > { %s1385_s29 = smov (!%p223_p2), 96   ;;  %s1386_s30 = smov (!%p223_p2), 110  }
   0xb   : > { %v276_v0 = vld [vmem:[%s1746_s1] sm:$0xff]  ;;  %v621_v1 = vld [vmem:[%s1746_s1 + $0x8] sm:$0xff]  ;;  %v1374_v2 = vmov 0   ;;  %s1753_s22 = smov (!%p257_p3, %s1183_s22), 1  ;;  %vm274_vm0 = vcmask 273408   ;;  %vm306_vm1 = vcmask 1043592  }
   0xc   : > { %1315 = vset.pattern.permute.xlu1 %v1374_v2  ;;  %273 = vst [vmem:[#allocation2] sm:$0xff] %v1374_v2  ;;  %1314 = vset.pattern.permute.xlu0 %v1374_v2  ;;  %v313_v3 = vld [vmem:[%s1745_s0] sm:$0x3]  ;;  %v622_v5 = vld [vmem:[%s1747_s2 + $0x8] sm:$0xff]  ;;  %s1270_s14 = sshll.u32 %s1753_s22, 3  ;;  %s1271_s15 = sshll.u32 %s1753_s22, 4 }
   0xd   : > { %619 = vst [vmem:[#allocation3] sm:$0xff] %v1374_v2  ;;  %283 = vperm.xlu1 %1315, %v276_v0   ;;  %627 = vperm.xlu0 %1314, %v621_v1   ;;  %v277_v4 = vld [vmem:[%s1747_s2] sm:$0xff]  ;;  %s261_s18 = scalar_lea.vmem %s1749_s4, %s1270_s14  ;;  %s266_s23 = scalar_lea.vmem %s1750_s5, %s1271_s15  ;;  %vm307_vm2 = vcmask 1047556   ;;  %vm302_vm3 = vcmask 138240   ;;  %vm310_vm4 = vcmask 134144   ;;  %vm485_vm6 = vcmask 146432  }
   0xe   : > { %315 = vst [vmem:[#allocation1] ss:$9 sm:$0xff] %v313_v3  ;;  %v350_v6 = vld [vmem:[%s1745_s0] sm:$0x3]  ;;  %vm308_vm5 = vmor %vm307_vm2, %vm306_vm1  ;;  %s1388_s8 = smov 94   ;;  %vm532_vm7 = vcmask 261120   ;;  %s271_s13 = scalar_lea.vmem %s1751_s6, %s1271_s15 }
   0xf   : > { %v399_v9 = vld [vmem:[%s1745_s0] sm:$0x3]  ;;  %620 = vst.msk [vmem:[#allocation3 + $0x8] sm:$0xf] %vm274_vm0, %v1374_v2  ;;  %vm421_vm8 = vcmask 130048   ;;  %vm374_vm9 = vcmask 15360  }
  0x10   : > { %v461_v12 = vld [vmem:[%s1745_s0] sm:$0x3]  ;;  %275 = vst.msk [vmem:[#allocation2 + $0x8] sm:$0xf] %vm274_vm0, %v1374_v2  ;;  %vm596_vm10 = vcmask 277504   ;;  %vm342_vm11 = vcmask 1043456  }
  0x11   : > { %v510_v21 = vld [vmem:[%s1745_s0] sm:$0x3]  ;;  %vm566_vm12 = vcmask 777216   ;;  %vm455_vm13 = vcmask 908288   ;;  %vm344_vm14 = vcmask 1039360   ;;  %vm440_vm15 = vcmask 916480  }
  0x12   : > { %v572_v33 = vld [vmem:[%s1745_s0] sm:$0x3]  ;;  %vm393_vm0 = vcmask 1031168   ;;  %vm551_vm1 = vcmask 785408   ;;  %vm504_vm2 = vcmask 900096  }
  0x13   : > { %v652_v43 = vld [vmem:[%s1745_s0] sm:$0x3] }
  0x14   : > { %v687_v55 = vld [vmem:[%s1745_s0] sm:$0x3] }
  0x15   : > { %290 = vperm.xlu1 %1315, %v277_v4   ;;  %634 = vperm.xlu0 %1314, %v622_v5   ;;  %v1454_v7 = vld [vmem:[#allocation1] sm:$0xff]  ;;  %v1456_v8 = vld [vmem:[#allocation1 + $0x9] sm:$0xff] }
  0x16   : > { %352 = vst [vmem:[#allocation1] ss:$9 sm:$0xff] %v350_v6  ;;  %v734_v1 = vld [vmem:[%s1745_s0] sm:$0x3] }
  0x1d   : > { %v353_v10 = vld [vmem:[#allocation1] sm:$0xff]  ;;  %v354_v11 = vld [vmem:[#allocation1 + $0x9] sm:$0xff] }
  0x1e   : > { %401 = vst [vmem:[#allocation1] ss:$9 sm:$0xff] %v399_v9  ;;  %v355_v15 = vshrl.u32 %v353_v10, 16  ;;  %v359_v16 = vshrl.u32 %v354_v11, 16 }
  0x20   : > { %v356_v17 = vpack.i.b16 %v355_v15, %v355_v15  ;;  %v360_v18 = vpack.i.b16 %v359_v16, %v359_v16  ;;  %v793_v16 = vld [vmem:[%s1745_s0] sm:$0x3] }
  0x22   : > { %v358_v19 = vperm.slane %v356_v17, 0  ;;  %v362_v20 = vperm.slane %v360_v18, 0 }
  0x24   : > { %v366_v22 = vunpack.c.l.bf16 %v358_v19  ;;  %v367_v23 = vunpack.c.l.bf16 %v362_v20 }
  0x25   : > { %v402_v13 = vld [vmem:[#allocation1] sm:$0xff]  ;;  %v403_v14 = vld [vmem:[#allocation1 + $0x9] sm:$0xff] }
  0x26   : > { %463 = vst [vmem:[#allocation1] ss:$9 sm:$0xff] %v461_v12  ;;  %v1316_v26 = vpack.i.bf16 %v367_v23, %v366_v22  ;;  %v404_v39 = vpack.i.b16 %v402_v13, %v402_v13  ;;  %v407_v40 = vpack.i.b16 %v403_v14, %v403_v14  ;;  %v840_v22 = vld [vmem:[%s1745_s0] sm:$0x3] }
  0x28   : > { %1317 = vrot.lane.b32.xlu1 %v1316_v26, %s1375_s17  ;;  %v406_v41 = vperm.slane %v404_v39, 0  ;;  %v409_v42 = vperm.slane %v407_v40, 0 }
  0x2a   : > { %v413_v44 = vunpack.c.l.bf16 %v406_v41  ;;  %v414_v45 = vunpack.c.l.bf16 %v409_v42 }
  0x2c   : > { %v1321_v48 = vpack.i.bf16 %v414_v45, %v413_v44 }
  0x2d   : > { %v464_v24 = vld [vmem:[#allocation1] sm:$0xff]  ;;  %v465_v25 = vld [vmem:[#allocation1 + $0x9] sm:$0xff] }
  0x2e   : > { %v466_v27 = vshrl.u32 %v464_v24, 16  ;;  %v470_v28 = vshrl.u32 %v465_v25, 16  ;;  %512 = vst [vmem:[#allocation1] ss:$9 sm:$0xff] %v510_v21  ;;  %1322 = vrot.lane.b32.xlu2 %v1321_v48, %s1377_s25 }
  0x30   : > { %v467_v29 = vpack.i.b16 %v466_v27, %v466_v27  ;;  %v471_v30 = vpack.i.b16 %v470_v28, %v470_v28 }
  0x32   : > { %v469_v31 = vperm.slane %v467_v29, 0  ;;  %v473_v32 = vperm.slane %v471_v30, 0 }
  0x34   : > { %v477_v34 = vunpack.c.l.bf16 %v469_v31  ;;  %v478_v35 = vunpack.c.l.bf16 %v473_v32 }
  0x35   : > { %v513_v36 = vld [vmem:[#allocation1] sm:$0xff]  ;;  %v514_v37 = vld [vmem:[#allocation1 + $0x9] sm:$0xff] }
  0x36   : > { %574 = vst [vmem:[#allocation1] ss:$9 sm:$0xff] %v572_v33  ;;  %v1326_v38 = vpack.i.bf16 %v478_v35, %v477_v34  ;;  %v515_v61 = vpack.i.b16 %v513_v36, %v513_v36  ;;  %v518_v62 = vpack.i.b16 %v514_v37, %v514_v37  ;;  %v899_v35 = vld [vmem:[%s1745_s0] sm:$0x3] }
  0x38   : > { %1327 = vrot.lane.b32.xlu0 %v1326_v38, %s1376_s20  ;;  %v517_v63 = vperm.slane %v515_v61, 0  ;;  %v520_v0 = vperm.slane %v518_v62, 0 }
  0x3a   : > { %v524_v3 = vunpack.c.l.bf16 %v517_v63  ;;  %v525_v4 = vunpack.c.l.bf16 %v520_v0 }
  0x3c   : > { %v1331_v11 = vpack.i.bf16 %v525_v4, %v524_v3  ;;  %v278_v3 = vld [vmem:[%s261_s18] sm:$0xff] }
  0x3d   : > { %v575_v46 = vld [vmem:[#allocation1] sm:$0xff]  ;;  %v576_v47 = vld [vmem:[#allocation1 + $0x9] sm:$0xff] }
  0x3e   : > { %654 = vst [vmem:[#allocation1] ss:$9 sm:$0xff] %v652_v43  ;;  %v577_v49 = vshrl.u32 %v575_v46, 16  ;;  %v581_v50 = vshrl.u32 %v576_v47, 16  ;;  %1332 = vrot.lane.b32.xlu2 %v1331_v11, %s1379_s7  ;;  %v623_v4 = vld [vmem:[%s266_s23] sm:$0xff] }
  0x40   : > { %v578_v51 = vpack.i.b16 %v577_v49, %v577_v49  ;;  %v582_v52 = vpack.i.b16 %v581_v50, %v581_v50 }
  0x42   : > { %v580_v53 = vperm.slane %v578_v51, 0  ;;  %v584_v54 = vperm.slane %v582_v52, 0 }
  0x44   : > { %v588_v56 = vunpack.c.l.bf16 %v580_v53  ;;  %v589_v57 = vunpack.c.l.bf16 %v584_v54 }
  0x45   : > { %v1479_v58 = vld [vmem:[#allocation1] sm:$0xff]  ;;  %v1481_v59 = vld [vmem:[#allocation1 + $0x9] sm:$0xff] }
  0x46   : > { %689 = vst [vmem:[#allocation1] ss:$9 sm:$0xff] %v687_v55  ;;  %v1336_v60 = vpack.i.bf16 %v589_v57, %v588_v56 }
  0x48   : > { %1337 = vrot.lane.b32.xlu1 %v1336_v60, %s1378_s28 }
  0x4d   : > { %v690_v5 = vld [vmem:[#allocation1] sm:$0xff]  ;;  %v691_v6 = vld [vmem:[#allocation1 + $0x9] sm:$0xff] }
  0x4e   : > { %v692_v9 = vshrl.u32 %v690_v5, 16  ;;  %v696_v10 = vshrl.u32 %v691_v6, 16  ;;  %736 = vst [vmem:[#allocation1] ss:$9 sm:$0xff] %v734_v1  ;;  %v624_v5 = vld [vmem:[%s266_s23 + $0x8] sm:$0xff]  ;;  %v279_v6 = vunpack.c.l.bf16 %v278_v3 }
  0x50   : > { %v693_v12 = vpack.i.b16 %v692_v9, %v692_v9  ;;  %v697_v13 = vpack.i.b16 %v696_v10, %v696_v10  ;;  %v280_v9 = vunpack.c.h.bf16 %v278_v3 }
  0x52   : > { %v695_v14 = vperm.slane %v693_v12, 0  ;;  %v699_v15 = vperm.slane %v697_v13, 0 }
  0x54   : > { %v703_v17 = vunpack.c.l.bf16 %v695_v14  ;;  %v704_v18 = vunpack.c.l.bf16 %v699_v15 }
  0x55   : > { %v737_v19 = vld [vmem:[#allocation1] sm:$0xff]  ;;  %v738_v20 = vld [vmem:[#allocation1 + $0x9] sm:$0xff] }
  0x56   : > { %v1341_v21 = vpack.i.bf16 %v704_v18, %v703_v17  ;;  %795 = vst [vmem:[#allocation1] ss:$9 sm:$0xff] %v793_v16  ;;  %v739_v27 = vpack.i.b16 %v737_v19, %v737_v19  ;;  %v742_v28 = vpack.i.b16 %v738_v20, %v738_v20 }
  0x58   : > { %1342 = vrot.lane.b32.xlu0 %v1341_v21, %s1375_s17  ;;  %v741_v31 = vperm.slane %v739_v27, 0  ;;  %v744_v32 = vperm.slane %v742_v28, 0 }
  0x5a   : > { %v748_v36 = vunpack.c.l.bf16 %v741_v31  ;;  %v749_v37 = vunpack.c.l.bf16 %v744_v32 }
  0x5c   : > { %v1346_v42 = vpack.i.bf16 %v749_v37, %v748_v36 }
  0x5d   : > { %v796_v23 = vld [vmem:[#allocation1] sm:$0xff]  ;;  %v797_v24 = vld [vmem:[#allocation1 + $0x9] sm:$0xff] }
  0x5e   : > { %v798_v25 = vshrl.u32 %v796_v23, 16  ;;  %v802_v26 = vshrl.u32 %v797_v24, 16  ;;  %842 = vst [vmem:[#allocation1] ss:$9 sm:$0xff] %v840_v22  ;;  %1347 = vrot.lane.b32.xlu2 %v1346_v42, %s1377_s25  ;;  %s1381_s25 = smov 127  }
  0x60   : > { %v799_v29 = vpack.i.b16 %v798_v25, %v798_v25  ;;  %v803_v30 = vpack.i.b16 %v802_v26, %v802_v26 }
  0x62   : > { %v801_v33 = vperm.slane %v799_v29, 0  ;;  %v805_v34 = vperm.slane %v803_v30, 0 }
  0x64   : > { %v809_v38 = vunpack.c.l.bf16 %v801_v33  ;;  %v810_v39 = vunpack.c.l.bf16 %v805_v34 }
  0x65   : > { %v843_v40 = vld [vmem:[#allocation1] sm:$0xff]  ;;  %v844_v41 = vld [vmem:[#allocation1 + $0x9] sm:$0xff] }
  0x66   : > { %v1351_v43 = vpack.i.bf16 %v810_v39, %v809_v38  ;;  %v845_v44 = vpack.i.b16 %v843_v40, %v843_v40  ;;  %v848_v45 = vpack.i.b16 %v844_v41, %v844_v41  ;;  %901 = vst [vmem:[#allocation1] ss:$9 sm:$0xff] %v899_v35  ;;  %v657_v39 = vpack.i.b16 %v1479_v58, %v1479_v58 }
  0x67   : > { %v660_v40 = vpack.i.b16 %v1481_v59, %v1481_v59  ;;  %v318_v41 = vpack.i.b16 %v1454_v7, %v1454_v7 }
  0x68   : > { %1352 = vrot.lane.b32.xlu0 %v1351_v43, %s1376_s20  ;;  %v847_v46 = vperm.slane %v845_v44, 0  ;;  %v850_v47 = vperm.slane %v848_v45, 0  ;;  %v321_v43 = vpack.i.b16 %v1456_v8, %v1456_v8  ;;  %v659_v44 = vperm.slane %v657_v39, 0 }
  0x69   : > { %v662_v58 = vperm.slane %v660_v40, 0 }
  0x6a   : > { %v854_v48 = vunpack.c.l.bf16 %v847_v46  ;;  %v855_v49 = vunpack.c.l.bf16 %v850_v47  ;;  %v323_v7 = vperm.slane %v321_v43, 0  ;;  %v665_v8 = vunpack.c.l.bf16 %v659_v44 }
  0x6c   : > { %v1356_v50 = vpack.i.bf16 %v855_v49, %v854_v48  ;;  %v320_v48 = vperm.slane %v318_v41, 0 }
  0x6d   : > { %v902_v51 = vld [vmem:[#allocation1] sm:$0xff]  ;;  %v903_v52 = vld [vmem:[#allocation1 + $0x9] sm:$0xff] }
  0x6e   : > { %1357 = vrot.lane.b32.xlu1 %v1356_v50, %s1379_s7  ;;  %v904_v53 = vshrl.u32 %v902_v51, 16  ;;  %v908_v54 = vshrl.u32 %v903_v52, 16  ;;  %s1387_s7 = smov 126  }
  0x70   : > { %v905_v55 = vpack.i.b16 %v904_v53, %v904_v53  ;;  %v909_v56 = vpack.i.b16 %v908_v54, %v908_v54 }
  0x72   : > { %v907_v57 = vperm.slane %v905_v55, 0  ;;  %v911_v60 = vperm.slane %v909_v56, 0  ;;  %v666_v55 = vunpack.c.l.bf16 %v662_v58  ;;  %v326_v56 = vunpack.c.l.bf16 %v320_v48 }
  0x74   : > { %v915_v61 = vunpack.c.l.bf16 %v907_v57  ;;  %v916_v62 = vunpack.c.l.bf16 %v911_v60 }
  0x76   : > { %v1361_v63 = vpack.i.bf16 %v916_v62, %v915_v61  ;;  %v327_v61 = vunpack.c.l.bf16 %v323_v7 }
  0x78   : > { %1362 = vrot.lane.b32.xlu0 %v1361_v63, %s1378_s28  ;;  %s1384_s28 = smov 112  }
  0x7f   : > { %v284_v0 = vpop.permute.xlu1 %283  ;;  %v628_v1 = vpop.permute.xlu0 %627 }
  0x80   : > { %v630_v10 = vmul.f32 %v628_v1, %v623_v4  ;;  %v631_v11 = vmul.f32 %v628_v1, %v624_v5  ;;  %v286_v13 = vmul.f32 %v284_v0, %v279_v6  ;;  %v287_v14 = vmul.f32 %v284_v0, %v280_v9 }
  0x87   : > { %v635_v12 = vpop.permute.xlu0 %634  ;;  %v291_v17 = vpop.permute.xlu1 %290 }
  0x88   : > { %v637_v15 = vadd.f32 %v635_v12, %v630_v10  ;;  %v638_v16 = vadd.f32 %v635_v12, %v631_v11  ;;  %v293_v20 = vadd.f32 %v291_v17, %v286_v13  ;;  %v294_v21 = vadd.f32 %v291_v17, %v287_v14  ;;  %v1520_v26 = vpop.permute.xlu2 %1322 }
  0x89   : > { %v1325_v7 = vunpack.i.h.bf16 %v1520_v26 }
  0x8a   : > { %v639_v18 = vmax.f32 %v637_v15, 0.0  ;;  %v640_v19 = vmax.f32 %v638_v16, 0.0  ;;  %v295_v23 = vmax.f32 %v293_v20, 0.0  ;;  %v296_v24 = vmax.f32 %v294_v21, 0.0 }
  0x8c   : > { %v641_v22 = vpack.c.bf16 %v640_v19, %v639_v18  ;;  %v297_v25 = vpack.c.bf16 %v296_v24, %v295_v23 }
  0x8e   : > { %643 = vrot.lane.b32.xlu2 %v641_v22, %s1380_s24 }
  0x96   : > { %299 = vrot.lane.b32.xlu2 %v297_v25, %s1380_s24 }
  0x98   : > { %v1522_v27 = vpop.permute.xlu2 %1332 }
  0x9a   : > { %v1526_v31 = vpop.permute.xlu1 %1317 }
  0xaa   : > { %v1528_v33 = vpop.permute.xlu0 %1327 }
  0xab   : > { %v1330_v43 = vunpack.i.h.bf16 %v1528_v33 }
  0xb8   : > { %v1524_v28 = vpop.permute.xlu2 %1347 }
  0xb9   : > { %v1350_v0 = vunpack.i.h.bf16 %v1524_v28 }
  0xba   : > { %v1531_v38 = vpop.permute.xlu1 %1337 }
  0xbb   : > { %v1340_v25 = vunpack.i.h.bf16 %v1531_v38 }
  0xca   : > { %v1540_v42 = vpop.permute.xlu0 %1342 }
  0xcb   : > { %v1345_v20 = vunpack.i.h.bf16 %v1540_v42 }
  0xda   : > { %v1568_v1 = vpop.permute.xlu0 %1352 }
  0xdb   : > { %v1355_v5 = vunpack.i.h.bf16 %v1568_v1 }
  0xe0   : > { %v1561_v53 = vpop.permute.xlu1 %1357 }
  0xe1   : > { %v1360_v3 = vunpack.i.h.bf16 %v1561_v53 }
  0xe8   : > { %v644_v29 = vpop.permute.xlu2 %643 }
  0xe9   : > { %v645_v30 = vrot.slane %v644_v29, 4 }
  0xeb   : > { %v646_v32 = vsel %vm302_vm3, %v645_v30, %v644_v29  ;;  %650 = vst.msk [vmem:[#allocation3 + $0x8] sm:$0xf] %vm310_vm4, %v645_v30 }
  0xec   : > { %649 = vst.msk [vmem:[#allocation3] sm:$0xff] %vm308_vm5, %v646_v32  ;;  %v1335_v32 = vunpack.i.h.bf16 %v1522_v27 }
  0xf0   : > { %v300_v2 = vpop.permute.xlu2 %299 }
  0xf1   : > { %v301_v34 = vrot.slane %v300_v2, 4 }
  0xf2   : > { %v672_v36 = vld [vmem:[#allocation3 + $0x8] sm:$0xf] }
  0xf3   : > { %v303_v35 = vsel %vm302_vm3, %v301_v34, %v300_v2  ;;  %311 = vst.msk [vmem:[#allocation2 + $0x8] sm:$0xf] %vm310_vm4, %v301_v34  ;;  %677 = vrot.lane.b32.xlu1 %v672_v36, %s1381_s25  ;;  %v778_v37 = vld [vmem:[#allocation3 + $0x8] sm:$0xf]  ;;  %v1544_v45 = vld [vmem:[#allocation3] sm:$0xff]  ;;  %vm615_vm3 = vcmask 769024  }
  0xf4   : > { %309 = vst.msk [vmem:[#allocation2] sm:$0xff] %vm308_vm5, %v303_v35  ;;  %783 = vrot.lane.b32.xlu2 %v778_v37, %s1382_s26  ;;  %v1552_v59 = vunpack.c.l.bf16 %v1544_v45  ;;  %v733_v50 = vld [vmem:[#allocation3 + $0x8] sm:$0xf]  ;;  %v1556_v51 = vunpack.c.h.bf16 %v1544_v45 }
  0xf5   : > { %v839_v54 = vld [vmem:[#allocation3 + $0x8] sm:$0xf]  ;;  %v747_v62 = vunpack.c.l.bf16 %v733_v50  ;;  %v1359_v50 = vunpack.i.l.bf16 %v1561_v53 }
  0xf6   : > { %v792_v57 = vld [vmem:[#allocation3 + $0x8] sm:$0xf]  ;;  %v667_v63 = vmul.f32 %v665_v8, %v1552_v59  ;;  %v853_v4 = vunpack.c.l.bf16 %v839_v54  ;;  %v668_v9 = vmul.f32 %v666_v55, %v1556_v51  ;;  %v1354_v55 = vunpack.i.l.bf16 %v1568_v1 }
  0xf7   : > { %v808_v6 = vunpack.c.l.bf16 %v792_v57  ;;  %v762_v12 = vmul.f32 %v1350_v0, %v747_v62  ;;  %v686_v15 = vld [vmem:[#allocation3 + $0x8] sm:$0xf]  ;;  %v862_v62 = vsel %vm532_vm7, %v1359_v50, %v1360_v3 }
  0xf8   : > { %v669_v13 = vpack.c.bf16 %v668_v9, %v667_v63  ;;  %v868_v14 = vmul.f32 %v1360_v3, %v853_v4  ;;  %v702_v22 = vunpack.c.l.bf16 %v686_v15  ;;  %v817_v4 = vsel %vm485_vm6, %v1354_v55, %v1355_v5 }
  0xf9   : > { %v823_v17 = vmul.f32 %v1355_v5, %v808_v6  ;;  %v764_v21 = vpack.c.bf16 %v762_v12, %v762_v12  ;;  %v866_v9 = vmul.f32 %v1359_v50, %v1552_v59  ;;  %v821_v1 = vmul.f32 %v1354_v55, %v1552_v59 }
  0xfa   : > { %v556_v46 = vld [vmem:[#allocation2 + $0x8] sm:$0xf]  ;;  %670 = vst [vmem:[#allocation4 + $0x48] sm:$0xff] %v669_v13  ;;  %v870_v23 = vpack.c.bf16 %v868_v14, %v868_v14  ;;  %v717_v2 = vmul.f32 %v1345_v20, %v702_v22  ;;  %v822_v3 = vmul.f32 %v817_v4, %v1556_v51  ;;  %v1344_v12 = vunpack.i.l.bf16 %v1540_v42 }
  0xfb   : > { %v445_v47 = vld [vmem:[#allocation2 + $0x8] sm:$0xf]  ;;  %561 = vrot.lane.b32.xlu0 %v556_v46, %s1383_s27  ;;  %v1547_v49 = vld [vmem:[#allocation2] sm:$0xff]  ;;  %781 = vrot.lane.b32.xlu1 %v1544_v45, %s1382_s26  ;;  %v825_v29 = vpack.c.bf16 %v823_v17, %v823_v17 }
  0xfc   : > { %450 = vrot.lane.b32.xlu2 %v445_v47, %s1382_s26  ;;  %v1559_v52 = vunpack.c.l.bf16 %v1547_v49  ;;  %v1564_v60 = vunpack.c.h.bf16 %v1547_v49  ;;  %v509_v18 = vld [vmem:[#allocation2 + $0x8] sm:$0xf]  ;;  %v719_v40 = vpack.c.bf16 %v717_v2, %v717_v2  ;;  %v1320_v47 = vunpack.i.h.bf16 %v1526_v31  ;;  %v1363_v2 = vpop.permute.xlu0 %1362 }
  0xfd   : > { %v571_v19 = vld [vmem:[#allocation2 + $0x8] sm:$0xf]  ;;  %v523_v24 = vunpack.c.l.bf16 %v509_v18  ;;  %v824_v14 = vpack.c.bf16 %v822_v3, %v821_v1  ;;  %v1334_v18 = vunpack.i.l.bf16 %v1522_v27 }
  0xfe   : > { %v328_v10 = vmul.f32 %v326_v56, %v1559_v52  ;;  %v329_v11 = vmul.f32 %v327_v61, %v1564_v60  ;;  %v587_v30 = vunpack.c.l.bf16 %v571_v19  ;;  %v349_v35 = vld [vmem:[#allocation2 + $0x8] sm:$0xf]  ;;  %v1349_v61 = vunpack.i.l.bf16 %v1524_v28 }
  0xff   : > { %v539_v34 = vmul.f32 %v1335_v32, %v523_v24  ;;  %v460_v37 = vld [vmem:[#allocation2 + $0x8] sm:$0xf]  ;;  %v365_v41 = vunpack.c.l.bf16 %v349_v35  ;;  %v711_v28 = vsel %vm374_vm9, %v1344_v12, %v1345_v20  ;;  %v533_v20 = vsel %vm532_vm7, %v1334_v18, %v1335_v32 }
 0x100   : > { %v330_v16 = vpack.c.bf16 %v329_v11, %v328_v10  ;;  %v603_v36 = vmul.f32 %v1340_v25, %v587_v30  ;;  %v398_v39 = vld [vmem:[#allocation2 + $0x8] sm:$0xf]  ;;  %v476_v46 = vunpack.c.l.bf16 %v460_v37  ;;  %v867_v10 = vmul.f32 %v862_v62, %v1556_v51 }
 0x101   : > { %v541_v44 = vpack.c.bf16 %v539_v34, %v539_v34  ;;  %v412_v48 = vunpack.c.l.bf16 %v398_v39  ;;  %v381_v8 = vmul.f32 %v1320_v47, %v365_v41  ;;  %v756_v53 = vsel %vm421_vm8, %v1349_v61, %v1350_v0 }
 0x102   : > { %331 = vst [vmem:[#allocation4] sm:$0xff] %v330_v16  ;;  %v605_v58 = vpack.c.bf16 %v603_v36, %v603_v36  ;;  %v492_v54 = vmul.f32 %v1330_v43, %v476_v46  ;;  %v760_v5 = vmul.f32 %v1349_v61, %v1552_v59  ;;  %v761_v11 = vmul.f32 %v756_v53, %v1556_v51 }
 0x103   : > { %675 = vrot.lane.b32.xlu0 %v1544_v45, %s1381_s25  ;;  %448 = vrot.lane.b32.xlu1 %v1547_v49, %s1382_s26  ;;  %v428_v56 = vmul.f32 %v1325_v7, %v412_v48  ;;  %v383_v57 = vpack.c.bf16 %v381_v8, %v381_v8  ;;  %v869_v13 = vpack.c.bf16 %v867_v10, %v866_v9  ;;  %v1339_v0 = vunpack.i.l.bf16 %v1531_v38 }
 0x104   : > { %559 = vrot.lane.b32.xlu2 %v1547_v49, %s1383_s27  ;;  %v494_v63 = vpack.c.bf16 %v492_v54, %v492_v54  ;;  %v763_v15 = vpack.c.bf16 %v761_v11, %v760_v5  ;;  %v715_v16 = vmul.f32 %v1344_v12, %v1552_v59  ;;  %v716_v17 = vmul.f32 %v711_v28, %v1556_v51 }
 0x105   : > { %v430_v6 = vpack.c.bf16 %v428_v56, %v428_v56  ;;  %v597_v19 = vsel %vm596_vm10, %v1339_v0, %v1340_v25  ;;  %v537_v22 = vmul.f32 %v1334_v18, %v1559_v52  ;;  %v1329_v38 = vunpack.i.l.bf16 %v1528_v33 }
 0x106   : > { %v718_v42 = vpack.c.bf16 %v716_v17, %v715_v16  ;;  %v601_v24 = vmul.f32 %v1339_v0, %v1559_v52  ;;  %v602_v25 = vmul.f32 %v597_v19, %v1564_v60  ;;  %v1319_v30 = vunpack.i.l.bf16 %v1526_v31 }
 0x107   : > { %v486_v27 = vsel %vm485_vm6, %v1329_v38, %v1330_v43  ;;  %v1365_v39 = vunpack.i.h.bf16 %v1363_v2 }
 0x108   : > { %v604_v32 = vpack.c.bf16 %v602_v25, %v601_v24  ;;  %v491_v35 = vmul.f32 %v486_v27, %v1564_v60  ;;  %v375_v33 = vsel %vm374_vm9, %v1319_v30, %v1320_v47  ;;  %v379_v41 = vmul.f32 %v1319_v30, %v1559_v52 }
 0x109   : > { %v380_v43 = vmul.f32 %v375_v33, %v1564_v60 }
 0x10b   : > { %769 = vrot.lane.b32.xlu0 %v764_v21, %s1384_s28  ;;  %875 = vrot.lane.b32.xlu1 %v870_v23, %s1385_s29  ;;  %v333_v21 = vld [vmem:[#allocation2 + $0x8] sm:$0xf]  ;;  %v538_v23 = vmul.f32 %v533_v20, %v1564_v60 }
 0x10c   : > { %830 = vrot.lane.b32.xlu2 %v825_v29, %s1386_s30 }
 0x10d   : > { %v540_v29 = vpack.c.bf16 %v538_v23, %v537_v22 }
 0x113   : > { %724 = vrot.lane.b32.xlu0 %v719_v40, %s1387_s7  ;;  %546 = vrot.lane.b32.xlu1 %v541_v44, %s1385_s29  ;;  %v1364_v40 = vunpack.i.l.bf16 %v1363_v2  ;;  %v898_v44 = vld [vmem:[#allocation3 + $0x8] sm:$0xf] }
 0x114   : > { %610 = vrot.lane.b32.xlu2 %v605_v58, %s1388_s8  ;;  %v914_v58 = vunpack.c.l.bf16 %v898_v44 }
 0x115   : > { %v923_v48 = vsel %vm596_vm10, %v1364_v40, %v1365_v39  ;;  %v927_v31 = vmul.f32 %v1364_v40, %v1552_v59 }
 0x116   : > { %v928_v47 = vmul.f32 %v923_v48, %v1556_v51 }
 0x118   : > { %v930_v8 = vpack.c.bf16 %v928_v47, %v927_v31 }
 0x11b   : > { %388 = vrot.lane.b32.xlu0 %v383_v57, %s1387_s7  ;;  %499 = vrot.lane.b32.xlu1 %v494_v63, %s1386_s30 }
 0x11c   : > { %435 = vrot.lane.b32.xlu2 %v430_v6, %s1384_s28 }
 0x123   : > { %873 = vrot.lane.b32.xlu0 %v869_v13, %s1385_s29  ;;  %828 = vrot.lane.b32.xlu1 %v824_v14, %s1386_s30 }
 0x124   : > { %767 = vrot.lane.b32.xlu2 %v763_v15, %s1384_s28 }
 0x12b   : > { %336 = vrot.lane.b32.xlu0 %v1547_v49, %s1381_s25  ;;  %338 = vrot.lane.b32.xlu1 %v333_v21, %s1381_s25  ;;  %v1324_v49 = vunpack.i.l.bf16 %v1520_v26  ;;  %v490_v26 = vmul.f32 %v1329_v38, %v1559_v52 }
 0x12c   : > { %722 = vrot.lane.b32.xlu2 %v718_v42, %s1387_s7 }
 0x12d   : > { %v422_v34 = vsel %vm421_vm8, %v1324_v49, %v1325_v7  ;;  %v426_v36 = vmul.f32 %v1324_v49, %v1559_v52  ;;  %v382_v7 = vpack.c.bf16 %v380_v43, %v379_v41  ;;  %v929_v52 = vmul.f32 %v1365_v39, %v914_v58 }
 0x12e   : > { %v427_v37 = vmul.f32 %v422_v34, %v1564_v60  ;;  %v884_v60 = vld [vmem:[#allocation3 + $0x8] sm:$0xf] }
 0x12f   : > { %v931_v50 = vpack.c.bf16 %v929_v52, %v929_v52 }
 0x130   : > { %v429_v46 = vpack.c.bf16 %v427_v37, %v426_v36 }
 0x133   : > { %544 = vrot.lane.b32.xlu0 %v540_v29, %s1385_s29  ;;  %608 = vrot.lane.b32.xlu1 %v604_v32, %s1388_s8 }
 0x134   : > { %887 = vrot.lane.b32.xlu2 %v1544_v45, %s1383_s27  ;;  %v493_v45 = vpack.c.bf16 %v491_v35, %v490_v26 }
 0x13b   : > { %497 = vrot.lane.b32.xlu0 %v493_v45, %s1386_s30  ;;  %433 = vrot.lane.b32.xlu1 %v429_v46, %s1384_s28 }
 0x13c   : > { %386 = vrot.lane.b32.xlu2 %v382_v7, %s1387_s7 }
 0x143   : > { %889 = vrot.lane.b32.xlu0 %v884_v60, %s1383_s27  ;;  %934 = vrot.lane.b32.xlu1 %v930_v8, %s1388_s8 }
 0x144   : > { %936 = vrot.lane.b32.xlu2 %v931_v50, %s1388_s8 }
 0x14e   : > { %v784_v54 = vpop.permute.xlu2 %783 }
 0x14f   : > { %v786_v4 = vrot.slane %v784_v54, 4 }
 0x156   : > { %v451_v55 = vpop.permute.xlu2 %450 }
 0x157   : > { %v453_v14 = vrot.slane %v451_v55, 4 }
 0x15e   : > { %v560_v56 = vpop.permute.xlu2 %559 }
 0x15f   : > { %v563_v62 = vrot.slane %v560_v56, 4 }
 0x165   : > { %v678_v57 = vpop.permute.xlu1 %677 }
 0x166   : > { %v1684_v61 = vpop.permute.xlu2 %830  ;;  %v680_v11 = vrot.slane %v678_v57, 4 }
 0x167   : > { %v833_v39 = vrot.slane %v1684_v61, 4 }
 0x16d   : > { %v562_v59 = vpop.permute.xlu0 %561  ;;  %v782_v51 = vpop.permute.xlu1 %781 }
 0x16e   : > { %v564_v63 = vrot.slane %v562_v59, 4  ;;  %v785_v6 = vrot.slane %v782_v51, 4  ;;  %v1686_v9 = vpop.permute.xlu2 %610 }
 0x170   : > { %v565_v10 = vsel %vm342_vm11, %v563_v62, %v564_v63  ;;  %v787_v53 = vsel %vm342_vm11, %v785_v6, %v786_v4  ;;  %v613_v4 = vrot.slane %v1686_v9, 4 }
 0x171   : > { %v567_v1 = vsel %vm566_vm12, %v560_v56, %v565_v10  ;;  %v788_v3 = vsel %vm455_vm13, %v782_v51, %v787_v53 }
 0x172   : > { %569 = vst [vmem:[#allocation4 + $0x38] sm:$0xff] %v567_v1 }
 0x173   : > { %790 = vst [vmem:[#allocation4 + $0x68] sm:$0xff] %v788_v3 }
 0x175   : > { %v676_v5 = vpop.permute.xlu0 %675  ;;  %v449_v13 = vpop.permute.xlu1 %448 }
 0x176   : > { %v679_v12 = vrot.slane %v676_v5, 4  ;;  %v452_v15 = vrot.slane %v449_v13, 4  ;;  %v1692_v28 = vpop.permute.xlu2 %435 }
 0x178   : > { %v681_v0 = vsel %vm342_vm11, %v679_v12, %v680_v11  ;;  %v454_v17 = vsel %vm342_vm11, %v452_v15, %v453_v14 }
 0x179   : > { %v682_v16 = vsel %vm344_vm14, %v676_v5, %v681_v0  ;;  %v456_v18 = vsel %vm455_vm13, %v449_v13, %v454_v17 }
 0x17a   : > { %684 = vst [vmem:[#allocation4 + $0x50] sm:$0xff] %v682_v16  ;;  %v1286_v3 = vld [vmem:[#allocation4 + $0x64] sm:$0xf0]  ;;  %v1246_v5 = vld [vmem:[#allocation4 + $0x68] sm:$0xf0] }
 0x17b   : > { %458 = vst [vmem:[#allocation4 + $0x20] sm:$0xff] %v456_v18 }
 0x17d   : > { %v770_v19 = vpop.permute.xlu0 %769  ;;  %v876_v21 = vpop.permute.xlu1 %875 }
 0x17e   : > { %v772_v42 = vrot.slane %v770_v19, 4  ;;  %v768_v20 = vpop.permute.xlu2 %767  ;;  %v878_v33 = vrot.slane %v876_v21, 4 }
 0x17f   : > { %v771_v22 = vrot.slane %v768_v20, 4 }
 0x181   : > { %v773_v23 = vsel %vm342_vm11, %v771_v22, %v772_v42  ;;  %v1236_v18 = vld [vmem:[#allocation4 + $0x50] sm:$0xf]  ;;  %v1283_v19 = vld [vmem:[#allocation4 + $0x54] sm:$0xf] }
 0x182   : > { %v774_v38 = vsel %vm440_vm15, %v768_v20, %v773_v23 }
 0x183   : > { %776 = vst [vmem:[#allocation4 + $0x60] sm:$0xff] %v774_v38 }
 0x185   : > { %v725_v24 = vpop.permute.xlu0 %724  ;;  %v547_v49 = vpop.permute.xlu1 %546 }
 0x186   : > { %v727_v25 = vrot.slane %v725_v24, 4  ;;  %v723_v29 = vpop.permute.xlu2 %722  ;;  %v549_v10 = vrot.slane %v547_v49, 4  ;;  %v438_v24 = vrot.slane %v1692_v28, 4 }
 0x187   : > { %v726_v27 = vrot.slane %v723_v29, 4 }
 0x189   : > { %v728_v30 = vsel %vm342_vm11, %v726_v27, %v727_v25 }
 0x18a   : > { %v729_v32 = vsel %vm393_vm0, %v723_v29, %v728_v30  ;;  %v1244_v51 = vld [vmem:[#allocation4 + $0x60] sm:$0xf]  ;;  %v1285_v63 = vld [vmem:[#allocation4 + $0x64] sm:$0xf]  ;;  %v1282_v30 = vld [vmem:[#allocation4 + $0x44] sm:$0xf0] }
 0x18b   : > { %731 = vst [vmem:[#allocation4 + $0x58] sm:$0xff] %v729_v32  ;;  %v1245_v12 = vor.u32 %v1286_v3, %v1244_v51  ;;  %v1249_v13 = vor.u32 %v1285_v63, %v1246_v5  ;;  %v1230_v32 = vld [vmem:[#allocation4 + $0x48] sm:$0xf0]  ;;  %v944_v51 = vld [vmem:[%s1748_s3] sm:$0xff] }
 0x18d   : > { %v389_v2 = vpop.permute.xlu0 %388  ;;  %v1702_v34 = vpop.permute.xlu1 %499 }
 0x18e   : > { %v1704_v26 = vpop.permute.xlu2 %887  ;;  %v391_v43 = vrot.slane %v389_v2, 4  ;;  %v502_v22 = vrot.slane %v1702_v34, 4 }
 0x192   : > { %v1284_v15 = vld [vmem:[#allocation4 + $0x54] sm:$0xf0]  ;;  %v1238_v0 = vld [vmem:[#allocation4 + $0x58] sm:$0xf0] }
 0x193   : > { %v1237_v42 = vor.u32 %v1284_v15, %v1236_v18  ;;  %v1241_v21 = vor.u32 %v1283_v19, %v1238_v0 }
 0x195   : > { %v874_v35 = vpop.permute.xlu0 %873  ;;  %v829_v37 = vpop.permute.xlu1 %828 }
 0x196   : > { %v877_v36 = vrot.slane %v874_v35, 4  ;;  %v832_v40 = vrot.slane %v829_v37, 4  ;;  %v387_v41 = vpop.permute.xlu2 %386 }
 0x197   : > { %v390_v45 = vrot.slane %v387_v41, 4 }
 0x198   : > { %v879_v44 = vsel %vm342_vm11, %v877_v36, %v878_v33  ;;  %v834_v58 = vsel %vm342_vm11, %v832_v40, %v833_v39 }
 0x199   : > { %v880_v46 = vsel %vm551_vm1, %v874_v35, %v879_v44  ;;  %v835_v48 = vsel %vm504_vm2, %v829_v37, %v834_v58  ;;  %v392_v7 = vsel %vm342_vm11, %v390_v45, %v391_v43  ;;  %v1280_v45 = vld [vmem:[#allocation4 + $0x34] sm:$0xf0] }
 0x19a   : > { %882 = vst [vmem:[#allocation4 + $0x78] sm:$0xff] %v880_v46  ;;  %v394_v31 = vsel %vm393_vm0, %v387_v41, %v392_v7  ;;  %v891_v41 = vrot.slane %v1704_v26, 4  ;;  %v1222_v46 = vld [vmem:[#allocation4 + $0x38] sm:$0xf0] }
 0x19b   : > { %837 = vst [vmem:[#allocation4 + $0x70] sm:$0xff] %v835_v48 }
 0x19c   : > { %396 = vst [vmem:[#allocation4 + $0x10] sm:$0xff] %v394_v31 }
 0x19d   : > { %v337_v47 = vpop.permute.xlu0 %336  ;;  %v339_v52 = vpop.permute.xlu1 %338 }
 0x19e   : > { %v340_v8 = vrot.slane %v337_v47, 4  ;;  %v341_v60 = vrot.slane %v339_v52, 4  ;;  %v937_v37 = vpop.permute.xlu2 %936  ;;  %v1212_v52 = vld [vmem:[#allocation4 + $0x20] sm:$0xf] }
 0x19f   : > { %v939_v58 = vrot.slane %v937_v37, 4 }
 0x1a0   : > { %v343_v50 = vsel %vm342_vm11, %v340_v8, %v341_v60 }
 0x1a1   : > { %v1288_v54 = vld [vmem:[#allocation4 + $0x74] sm:$0xf0]  ;;  %v1254_v55 = vld [vmem:[#allocation4 + $0x78] sm:$0xf0]  ;;  %v345_v56 = vsel %vm344_vm14, %v337_v47, %v343_v50 }
 0x1a2   : > { %v1252_v57 = vld [vmem:[#allocation4 + $0x70] sm:$0xf]  ;;  %v1287_v61 = vld [vmem:[#allocation4 + $0x74] sm:$0xf]  ;;  %347 = vst [vmem:[#allocation4 + $0x8] sm:$0xff] %v345_v56 }
 0x1a3   : > { %v1253_v59 = vor.u32 %v1288_v54, %v1252_v57  ;;  %v1257_v62 = vor.u32 %v1287_v61, %v1254_v55  ;;  %v1277_v54 = vld [vmem:[#allocation4 + $0x24] sm:$0xf]  ;;  %v1275_v63 = vld [vmem:[#allocation4 + $0x14] sm:$0xf] }
 0x1a5   : > { %1062 = vmatpush.bf16.msra.mxu0 %v1253_v59  ;;  %1088 = vmatpush.bf16.msra.mxu2 %v1257_v62  ;;  %v545_v6 = vpop.permute.xlu0 %544  ;;  %v609_v53 = vpop.permute.xlu1 %608 }
 0x1a6   : > { %v548_v1 = vrot.slane %v545_v6, 4  ;;  %v612_v11 = vrot.slane %v609_v53, 4 }
 0x1a8   : > { %v550_v14 = vsel %vm342_vm11, %v548_v1, %v549_v10  ;;  %v614_v16 = vsel %vm342_vm11, %v612_v11, %v613_v4  ;;  %v965_v1 = vunpack.c.h.b16 %v944_v51 }
 0x1a9   : > { %v552_v9 = vsel %vm551_vm1, %v545_v6, %v550_v14  ;;  %1063 = vmatpush.bf16.msra.mxu0 %v1245_v12  ;;  %1089 = vmatpush.bf16.msra.mxu2 %v1249_v13  ;;  %v616_v17 = vsel %vm615_vm3, %v609_v53, %v614_v16  ;;  %v1274_v10 = vld [vmem:[#allocation4 + $0x4] sm:$0xf0]  ;;  %v964_v53 = vunpack.c.l.b16 %v944_v51  ;;  %v1198_v5 = vld [vmem:[#allocation4 + $0x8] sm:$0xf0]  ;;  %v1196_v12 = vld [vmem:[#allocation4] sm:$0xf] }
 0x1aa   : > { %554 = vst [vmem:[#allocation4 + $0x30] sm:$0xff] %v552_v9  ;;  %v1197_v15 = vor.u32 %v1274_v10, %v1196_v12  ;;  %v1273_v16 = vld [vmem:[#allocation4 + $0x4] sm:$0xf]  ;;  %v967_v19 = vpack.c.b16 %v965_v1, %v965_v1 }
 0x1ab   : > { %618 = vst [vmem:[#allocation4 + $0x40] sm:$0xff] %v616_v17  ;;  %v1201_v17 = vor.u32 %v1273_v16, %v1198_v5  ;;  %v966_v18 = vpack.c.b16 %v964_v53, %v964_v53 }
 0x1ad   : > { %1064 = vmatpush.bf16.msra.mxu0 %v1237_v42  ;;  %1090 = vmatpush.bf16.msra.mxu2 %v1241_v21  ;;  %v498_v20 = vpop.permute.xlu0 %497  ;;  %v434_v23 = vpop.permute.xlu1 %433 }
 0x1ae   : > { %v501_v38 = vrot.slane %v498_v20, 4  ;;  %v437_v25 = vrot.slane %v434_v23, 4 }
 0x1b0   : > { %v503_v49 = vsel %vm342_vm11, %v501_v38, %v502_v22  ;;  %v439_v29 = vsel %vm342_vm11, %v437_v25, %v438_v24 }
 0x1b1   : > { %v505_v27 = vsel %vm504_vm2, %v498_v20, %v503_v49  ;;  %v441_v2 = vsel %vm440_vm15, %v434_v23, %v439_v29  ;;  %v1220_v39 = vld [vmem:[#allocation4 + $0x30] sm:$0xf]  ;;  %v1279_v28 = vld [vmem:[#allocation4 + $0x34] sm:$0xf] }
 0x1b2   : > { %507 = vst [vmem:[#allocation4 + $0x28] sm:$0xff] %v505_v27  ;;  %v1228_v35 = vld [vmem:[#allocation4 + $0x40] sm:$0xf]  ;;  %v1281_v33 = vld [vmem:[#allocation4 + $0x44] sm:$0xf]  ;;  %v1221_v7 = vor.u32 %v1280_v45, %v1220_v39  ;;  %v1225_v31 = vor.u32 %v1279_v28, %v1222_v46 }
 0x1b3   : > { %443 = vst [vmem:[#allocation4 + $0x18] sm:$0xff] %v441_v2  ;;  %v1229_v34 = vor.u32 %v1282_v30, %v1228_v35  ;;  %v1233_v36 = vor.u32 %v1281_v33, %v1230_v32 }
 0x1b5   : > { %1065 = vmatpush.bf16.msra.mxu0 %v1229_v34  ;;  %1091 = vmatpush.bf16.msra.mxu2 %v1233_v36  ;;  %v890_v40 = vpop.permute.xlu0 %889  ;;  %v935_v43 = vpop.permute.xlu1 %934 }
 0x1b6   : > { %v892_v44 = vrot.slane %v890_v40, 4  ;;  %v938_v48 = vrot.slane %v935_v43, 4 }
 0x1b8   : > { %v893_v47 = vsel %vm342_vm11, %v891_v41, %v892_v44  ;;  %v940_v8 = vsel %vm342_vm11, %v938_v48, %v939_v58 }
 0x1b9   : > { %v894_v60 = vsel %vm566_vm12, %v1704_v26, %v893_v47  ;;  %1066 = vmatpush.bf16.msra.mxu0 %v1221_v7  ;;  %1092 = vmatpush.bf16.msra.mxu2 %v1225_v31  ;;  %v1278_v50 = vld [vmem:[#allocation4 + $0x24] sm:$0xf0]  ;;  %v1214_v55 = vld [vmem:[#allocation4 + $0x28] sm:$0xf0]  ;;  %v941_v56 = vsel %vm615_vm3, %v935_v43, %v940_v8  ;;  %v1204_v26 = vld [vmem:[#allocation4 + $0x10] sm:$0xf] }
 0x1ba   : > { %896 = vst [vmem:[#allocation4 + $0x80] sm:$0xff] %v894_v60  ;;  %v1213_v57 = vor.u32 %v1278_v50, %v1212_v52  ;;  %v1217_v61 = vor.u32 %v1277_v54, %v1214_v55  ;;  %v1276_v59 = vld [vmem:[#allocation4 + $0x14] sm:$0xf0]  ;;  %v1206_v62 = vld [vmem:[#allocation4 + $0x18] sm:$0xf0] }
 0x1bb   : > { %943 = vst [vmem:[#allocation4 + $0x88] sm:$0xff] %v941_v56  ;;  %v1205_v4 = vor.u32 %v1276_v59, %v1204_v26  ;;  %v1209_v6 = vor.u32 %v1275_v63, %v1206_v62 }
 0x1bd   : > { %1067 = vmatpush.bf16.msra.mxu0 %v1213_v57  ;;  %1093 = vmatpush.bf16.msra.mxu2 %v1217_v61 }
 0x1c1   : > { %1068 = vmatpush.bf16.msra.mxu0 %v1205_v4  ;;  %1094 = vmatpush.bf16.msra.mxu2 %v1209_v6  ;;  %v1260_v3 = vld [vmem:[#allocation4 + $0x80] sm:$0xf]  ;;  %v1289_v11 = vld [vmem:[#allocation4 + $0x84] sm:$0xf] }
 0x1c2   : > { %v1290_v13 = vld [vmem:[#allocation4 + $0x84] sm:$0xf0]  ;;  %v1262_v14 = vld [vmem:[#allocation4 + $0x88] sm:$0xf0] }
 0x1c3   : > { %v1261_v0 = vor.u32 %v1290_v13, %v1260_v3  ;;  %v1265_v9 = vor.u32 %v1289_v11, %v1262_v14 }
 0x1c5   : > { %1069 = vmatpush.bf16.msra.mxu0 %v1197_v15  ;;  %1082 = vmatpush.bf16.msra.mxu1 %v1261_v0 }
 0x1c6   : > { %1095 = vmatpush.bf16.msra.mxu2 %v1201_v17  ;;  %1108 = vmatpush.bf16.msra.mxu3 %v1265_v9 }
 0x1c8   : > { %1070 = vmatmul.bf16.vlgmr.msra.gmra.mxu0 %v966_v18  ;;  %1266 = vmatmul.msk.bf16.vlgmr.msra.gmra.mxu1 %vm421_vm8, %v967_v19 }
 0x1c9   : > { %1096 = vmatmul.bf16.vlgmr.msra.gmra.mxu2 %v966_v18  ;;  %1267 = vmatmul.msk.bf16.vlgmr.msra.gmra.mxu3 %vm421_vm8, %v967_v19 }
 0x245   : > { %v1071_v42 = vpop.f32.mrf.mxu0  ;;  %v1084_v21 = vpop.f32.mrf.mxu1 }
 0x246   : > { %v1085_v20 = vadd.f32 %v1084_v21, %v1071_v42 }
 0x248   : > { %1114 = vst [vmem:[%s271_s13] sm:$0xff] %v1085_v20 }
 0x24c   : > { %v1097_v22 = vpop.f32.mrf.mxu2  ;;  %v1110_v23 = vpop.f32.mrf.mxu3 }
 0x24d   : > { %v1111_v38 = vadd.f32 %v1110_v23, %v1097_v22  ;;  %v1073_v24 = vpop.f32.mrf.mxu0  ;;  %v1086_v25 = vpop.f32.mrf.mxu1 }
 0x24f   : > { %1115 = vst [vmem:[%s271_s13 + $0x8] sm:$0xff] %v1111_v38 }
 0x254   : > { %v1099_v49 = vpop.f32.mrf.mxu2  ;;  %v1112_v29 = vpop.f32.mrf.mxu3 }
 0x255 PF: > { %s16_s21 = sadd.s32 1, %s1372_s21  }
 0x256   : > { %p13_p4 = scmp.ge.s32.totalorder %s16_s21, 4  }
 0x258   :  { %15 = sbr.rel (!%p13_p4) target bundleno = 1 (0x1), region = 77 }

</bundles_post_ra>
